<compile_context>
chip_gen: v6e
topology: v6e:2x2x1
jax: 0.10.0
libtpu: 0.0.40
codegen_flags: <defaults>
</compile_context>

<pallas_src>
import functools

import numpy as np
import jax
import jax.numpy as jnp
from jax.experimental import pallas as pl
from jax.experimental.pallas import tpu as pltpu

# ----------------------------- config (cfg.*) ------------------------------
N_QUBITS = 5
N_A_QUBITS = 2
NUM_CLASSES = 2
G_QUBITS = N_QUBITS - N_A_QUBITS        # 3  (generator qubits)
DIMG = 2 ** G_QUBITS                    # 8  (generator state dim)
DIMT = 2 ** N_QUBITS                    # 32 (full device state dim)
DIMA = 2 ** N_A_QUBITS                  # 4  (ancilla measurement outcomes)
G_DEPTH = 2
T_DEPTH = 2

PACK = 128 // DIMG                      # 16 samples per 128-lane row
OUT_W = 128 // PACK                     # 8 output slots / sample: fid|fake2|true4|pad
assert 1 + NUM_CLASSES + DIMA <= OUT_W


# --------------------- host-side circuit unitary builders ------------------
def _kron_list(mats):
    out = np.array([[1.0 + 0.0j]])
    for m in mats:
        out = np.kron(out, m)
    return out


def _rot(phi, theta, omega):
    # PennyLane Rot(phi, theta, omega) = RZ(omega) RY(theta) RZ(phi)
    c, s = np.cos(theta / 2.0), np.sin(theta / 2.0)
    return np.array(
        [[np.exp(-0.5j * (phi + omega)) * c, -np.exp(0.5j * (phi - omega)) * s],
         [np.exp(0.5j * (phi - omega)) * s, np.exp(0.5j * (phi + omega)) * c]],
        dtype=complex)


def _single(gate, wire, n):
    mats = [np.eye(2, dtype=complex)] * n
    mats[wire] = gate
    return _kron_list(mats)


def _cz(a, b, n):
    idx = np.arange(2 ** n)
    ba = (idx >> (n - 1 - a)) & 1
    bb = (idx >> (n - 1 - b)) & 1
    return np.diag(np.where((ba == 1) & (bb == 1), -1.0, 1.0)).astype(complex)


def _cnot(ctrl, tgt, n):
    dim = 2 ** n
    u = np.zeros((dim, dim), dtype=complex)
    for idx in range(dim):
        bit_c = (idx >> (n - 1 - ctrl)) & 1
        u[idx ^ (bit_c << (n - 1 - tgt)), idx] = 1.0
    return u


def _generator_unitary(gw, depth, nq, clamp_flag):
    # Rot layer on every qubit, then CZ ring (skipped when clamp=True).
    u = np.eye(2 ** nq, dtype=complex)
    for i in range(depth):
        for y in range(nq):
            u = _single(_rot(*gw[i, y]), y, nq) @ u
        if not clamp_flag:
            for y in range(nq):
                u = _cz(y, (y + 1) % nq, nq) @ u
    return u


def _target_unitary(tw, depth, nq):
    # Rot layer on every qubit, then CNOT ring.
    u = np.eye(2 ** nq, dtype=complex)
    for i in range(depth):
        for y in range(nq):
            u = _single(_rot(*tw[i, y]), y, nq) @ u
        for y in range(nq):
            u = _cnot(y, (y + 1) % nq, nq) @ u
    return u


def _circuit_unitaries(gen_params, tar_params, g_depth, t_depth, clamp):
    gw = np.asarray(gen_params, dtype=np.float64).reshape(g_depth, G_QUBITS, 3)
    tw = np.asarray(tar_params, dtype=np.float64).reshape(t_depth, N_QUBITS, 3)
    clamp_flag = clamp is not None
    if clamp_flag:
        gw = np.clip(gw, -clamp, clamp)

    u_gen = _generator_unitary(gw, g_depth, G_QUBITS, clamp_flag)      # (8, 8)
    u_tar = _target_unitary(tw, t_depth, N_QUBITS)                     # (32, 32)
    # generator gates act on wires 0..G_QUBITS-1 of the full device;
    # ancilla wires start in |0>, so only every DIMA-th column is used.
    u_fake_sub = (u_tar @ np.kron(u_gen, np.eye(DIMA, dtype=complex)))[:, ::DIMA]
    u_cls_sub = u_tar[:, ::DIMA]
    return u_gen, u_fake_sub, u_cls_sub


def build_operators(gen_params, tar_params, g_depth=G_DEPTH, t_depth=T_DEPTH,
                    clamp=None):
    """Host-side parameter setup.  Call ONCE per parameter set; the returned
    device arrays are reused across qgen_forward calls (keeps the numpy /
    host->device glue out of the per-batch hot path)."""
    u_gen, u_fake_sub, u_cls_sub = _circuit_unitaries(
        gen_params, tar_params, g_depth, t_depth, clamp)

    eye = np.eye(PACK)
    bd = lambda u: np.kron(eye, u)          # 16-way block-diagonal replica

    # fused per-sample weights: [gen_re | gen_im | fake_re | fake_im | cls_re | cls_im]
    w_all = np.concatenate(
        [bd(u_gen.T.real), bd(u_gen.T.imag),            # 2 x (128, 128)
         bd(u_fake_sub.T.real), bd(u_fake_sub.T.imag),  # 2 x (128, 512)
         bd(u_cls_sub.T.real), bd(u_cls_sub.T.imag)],   # 2 x (128, 512)
        axis=1).astype(np.float32)                      # (128, 2304)

    # per-8-lane-segment sum, broadcast back to all 8 lanes (for the norm)
    segb8 = np.kron(eye, np.ones((DIMG, DIMG))).astype(np.float32)     # (128, 128)

    # per-sample sum of 8 lanes -> scattered to output lane 8*s (fidelity slot)
    s_blk = np.zeros((DIMG, OUT_W))
    s_blk[:, 0] = 1.0
    sfid = np.kron(eye, s_blk).astype(np.float32)                      # (128, 128)

    # ancilla marginalization + scatter to final output lanes
    mf_blk = np.zeros((DIMT, OUT_W))    # fake class probs  -> lanes 8s+1..8s+2
    ms_blk = np.zeros((DIMT, OUT_W))    # fake class sum    -> lanes 8s+1..8s+2
    mt_blk = np.zeros((DIMT, OUT_W))    # classifier probs  -> lanes 8s+3..8s+6
    for j in range(DIMT):
        a = j % DIMA                    # ancilla wires are the low bits
        mt_blk[j, 1 + NUM_CLASSES + a] = 1.0
        if a < NUM_CLASSES:
            mf_blk[j, 1 + a] = 1.0
            ms_blk[j, 1:1 + NUM_CLASSES] = 1.0
    mfake = np.kron(eye, mf_blk).astype(np.float32)                    # (512, 128)
    msum = np.kron(eye, ms_blk).astype(np.float32)                     # (512, 128)
    mtrue = np.kron(eye, mt_blk).astype(np.float32)                    # (512, 128)

    return tuple(jnp.asarray(a) for a in (segb8, w_all, sfid, mfake, msum, mtrue))


# ------------------------------ Pallas kernel ------------------------------
def qgen_kernel(x_ref, segb8_ref, w_ref, sfid_ref, mfake_ref, msum_ref,
                mtrue_ref, out_ref):
    x = x_ref[...]                                                # (TBR, 128)

    # AmplitudeEmbedding(normalize=True): per-sample (8-lane segment) L2 norm.
    # maximum() guards all-zero / padded segments so no NaN/Inf ever enters
    # the MXU (a NaN row would poison the 15 neighbouring packed samples).
    segsum = jnp.dot(x * x, segb8_ref[...], preferred_element_type=jnp.float32)
    psi = x * jax.lax.rsqrt(jnp.maximum(segsum, 1e-30))

    # one fused MXU matmul for all six (real/imag) circuit applications
    y = jnp.dot(psi, w_ref[...], preferred_element_type=jnp.float32)  # (TBR, 2304)
    f_re, f_im = y[:, 0:128], y[:, 128:256]            # show_fake_img state
    p_re, p_im = y[:, 256:768], y[:, 768:1280]         # quantum_fake state
    c_re, c_im = y[:, 1280:1792], y[:, 1792:2304]      # quantum_classifier state

    # fids = |<enc_x, fakes>| (torch.bmm has no conjugation; enc_x is real),
    # scattered to lane 8*s of each sample (0 elsewhere).
    ip_re = jnp.dot(psi * f_re, sfid_ref[...], preferred_element_type=jnp.float32)
    ip_im = jnp.dot(psi * f_im, sfid_ref[...], preferred_element_type=jnp.float32)
    fid_sc = jnp.sqrt(ip_re * ip_re + ip_im * ip_im)

    # quantum_fake: ancilla-wire marginal probs, keep first NUM_CLASSES and
    # renormalize; lands on lanes 8*s+1 .. 8*s+NUM_CLASSES.
    prob_f = p_re * p_re + p_im * p_im                              # (TBR, 512)
    fp_sc = jnp.dot(prob_f, mfake_ref[...], preferred_element_type=jnp.float32)
    fpsum_sc = jnp.dot(prob_f, msum_ref[...], preferred_element_type=jnp.float32)
    lane = jax.lax.broadcasted_iota(jnp.int32, fp_sc.shape, 1) & 7
    off_class = jnp.logical_or(lane < 1, lane > NUM_CLASSES).astype(jnp.float32)
    # +1 on non-class lanes keeps the (zero) off-class entries finite.
    fake_sc = fp_sc * pl.reciprocal(fpsum_sc + off_class, approx=True)

    # quantum_classifier: ancilla-wire marginal probs (all DIMA outcomes),
    # lands on lanes 8*s+3 .. 8*s+6.
    prob_c = c_re * c_re + c_im * c_im                              # (TBR, 512)
    true_sc = jnp.dot(prob_c, mtrue_ref[...], preferred_element_type=jnp.float32)

    # lane-dense packed output: [fid | fake0 fake1 | true0..true3 | 0] per sample
    out_ref[...] = fid_sc + fake_sc + true_sc


# -------------------------------- wrapper ----------------------------------
def _round_up(n, m):
    return ((n + m - 1) // m) * m


@functools.partial(jax.jit, static_argnames=("test", "block_rows"))
def qgen_forward(x, ops, test=False, block_rows=128):
    segb8, w_all, sfid, mfake, msum, mtrue = ops
    b = x.shape[0]
    xf = jnp.reshape(x, (b, -1)).astype(jnp.float32)
    feat = xf.shape[1]
    assert feat <= DIMG, "flattened input must fit 2**g_qubits amplitudes"
    if feat < DIMG:                                   # AmplitudeEmbedding pad_with=0
        xf = jnp.pad(xf, ((0, 0), (0, DIMG - feat)))

    # ---- pack 16 samples per 128-lane row, pad batch to a grid multiple ----
    r = -(-b // PACK)                                 # packed rows needed
    tbr = min(block_rows, _round_up(max(r, 1), 8))    # rows per grid step (mult of 8)
    rpad = _round_up(r, tbr)
    bpad = rpad * PACK
    if bpad > b:
        # pad samples are |0> (amplitude 1 in slot 0): finite everywhere, so
        # they cannot leak NaN/Inf into neighbouring packed samples.
        pad = jnp.zeros((bpad - b, DIMG), jnp.float32).at[:, 0].set(1.0)
        xf = jnp.concatenate([xf, pad], axis=0)
    xp = xf.reshape(rpad, PACK * DIMG)                # (rpad, 128)

    const2 = lambda i: (0, 0)
    out = pl.pallas_call(
        qgen_kernel,
        out_shape=jax.ShapeDtypeStruct((rpad, 128), jnp.float32),
        grid=(rpad // tbr,),
        in_specs=[
            pl.BlockSpec((tbr, 128), lambda i: (i, 0)),     # packed inputs (tiled)
            pl.BlockSpec(segb8.shape, const2),              # resident weights
            pl.BlockSpec(w_all.shape, const2),
            pl.BlockSpec(sfid.shape, const2),
            pl.BlockSpec(mfake.shape, const2),
            pl.BlockSpec(msum.shape, const2),
            pl.BlockSpec(mtrue.shape, const2),
        ],
        out_specs=pl.BlockSpec((tbr, 128), lambda i: (i, 0)),
        compiler_params=pltpu.CompilerParams(
            dimension_semantics=("parallel",)),             # 2x on v7x (2 TCs)
    )(xp, segb8, w_all, sfid, mfake, msum, mtrue)

    res = out.reshape(rpad * PACK, OUT_W)[:b]               # unpack + drop padding
    fids = res[:, 0:1]
    fake_preds = res[:, 1:1 + NUM_CLASSES]
    true_preds = res[:, 1 + NUM_CLASSES:1 + NUM_CLASSES + DIMA]
    return fids, fake_preds, (true_preds if test else None)


# ----------------------------- reference check -----------------------------
def _reference(xf, gen_params, tar_params, g_depth, t_depth, clamp):
    u_gen, u_fake_sub, u_cls_sub = _circuit_unitaries(
        gen_params, tar_params, g_depth, t_depth, clamp)
    xf = np.asarray(xf, dtype=np.float64)
    psi = xf / np.linalg.norm(xf, axis=1, keepdims=True)
    fakes = psi @ u_gen.T
    fids = np.abs(np.sum(psi * fakes, axis=1, keepdims=True))
    phi = psi @ u_fake_sub.T
    probs_a = (np.abs(phi) ** 2).reshape(xf.shape[0], DIMG, DIMA).sum(axis=1)
    fp = probs_a[:, :NUM_CLASSES]
    fp = fp / fp.sum(axis=1, keepdims=True)
    chi = psi @ u_cls_sub.T
    tp = (np.abs(chi) ** 2).reshape(xf.shape[0], DIMG, DIMA).sum(axis=1)
    return fids, fp, tp


if __name__ == "__main__":
    key = jax.random.PRNGKey(0)
    kx, kt, kg = jax.random.split(key, 3)

    # small image-like input: flattens to 8 features = 2**g_qubits amplitudes;
    # batch 37 is not a multiple of 16, exercising the packing/padding path.
    B = 37
    x = jax.random.normal(kx, (B, 2, 2, 2), dtype=jnp.float32)
    tar_params = jax.random.uniform(kt, (T_DEPTH * N_QUBITS * 3,), dtype=jnp.float32)
    xf_np = np.asarray(jnp.reshape(x, (B, -1)))

    # case 1: module init (gen_params = 0 * torch.rand = zeros), clamp=None
    gen_params = jnp.zeros((G_DEPTH * G_QUBITS * 3,), dtype=jnp.float32)
    ops = build_operators(gen_params, tar_params, clamp=None)
    fids, fake_preds, true_preds = qgen_forward(x, ops, test=True)
    jax.block_until_ready((fids, fake_preds, true_preds))
    r_fid, r_fake, r_true = _reference(xf_np, gen_params, tar_params,
                                       G_DEPTH, T_DEPTH, None)
    assert np.allclose(np.asarray(fids), r_fid, atol=1e-3)
    assert np.allclose(np.asarray(true_preds), r_true, atol=1e-3)
    assert np.allclose(np.asarray(fake_preds), r_fake, atol=5e-3)  # approx recip

    # case 2: random generator params with clamp (exercises the CZ-free circuit)
    gen_params2 = 2.0 * jax.random.uniform(kg, (G_DEPTH * G_QUBITS * 3,),
                                           dtype=jnp.float32)
    ops2 = build_operators(gen_params2, tar_params, clamp=0.8)
    fids2, fake2, true2 = qgen_forward(x, ops2, test=True)
    jax.block_until_ready((fids2, fake2, true2))
    r_fid2, r_fake2, r_true2 = _reference(xf_np, gen_params2, tar_params,
                                          G_DEPTH, T_DEPTH, 0.8)
    assert np.allclose(np.asarray(fids2), r_fid2, atol=1e-3)
    assert np.allclose(np.asarray(true2), r_true2, atol=1e-3)
    assert np.allclose(np.asarray(fake2), r_fake2, atol=5e-3)

    print("KERNEL_OK")
</pallas_src>

<mosaic_0001>
module attributes {stable_mosaic.version = 11 : i64} {
  func.func @qgen_kernel(%arg0: i32, %arg1: memref<8x128xf32, #tpu.memory_space<vmem>>, %arg2: memref<128x128xf32, #tpu.memory_space<vmem>>, %arg3: memref<128x2304xf32, #tpu.memory_space<vmem>>, %arg4: memref<128x128xf32, #tpu.memory_space<vmem>>, %arg5: memref<512x128xf32, #tpu.memory_space<vmem>>, %arg6: memref<512x128xf32, #tpu.memory_space<vmem>>, %arg7: memref<512x128xf32, #tpu.memory_space<vmem>>, %arg8: memref<8x128xf32, #tpu.memory_space<vmem>>) attributes {dimension_semantics = [#tpu.dimension_semantics<parallel>], iteration_bounds = array<i64: 1>, scalar_prefetch = 0 : i64, scratch_operands = 0 : i64, tpu.core_type = #tpu.core_type<tc>, window_params = [{transform_indices = @transform_0, window_bounds = array<i64: 8, 128>}, {pipeline_mode = #tpu.pipeline_mode<synchronous>, transform_indices = @transform_1, window_bounds = array<i64: 128, 128>}, {pipeline_mode = #tpu.pipeline_mode<synchronous>, transform_indices = @transform_2, window_bounds = array<i64: 128, 2304>}, {pipeline_mode = #tpu.pipeline_mode<synchronous>, transform_indices = @transform_3, window_bounds = array<i64: 128, 128>}, {pipeline_mode = #tpu.pipeline_mode<synchronous>, transform_indices = @transform_4, window_bounds = array<i64: 512, 128>}, {pipeline_mode = #tpu.pipeline_mode<synchronous>, transform_indices = @transform_5, window_bounds = array<i64: 512, 128>}, {pipeline_mode = #tpu.pipeline_mode<synchronous>, transform_indices = @transform_6, window_bounds = array<i64: 512, 128>}, {transform_indices = @transform_7, window_bounds = array<i64: 8, 128>}]} {
    %c0 = arith.constant 0 : index
    %c0_0 = arith.constant 0 : index
    %0 = vector.load %arg1[%c0, %c0_0] : memref<8x128xf32, #tpu.memory_space<vmem>>, vector<8x128xf32>
    %1 = arith.mulf %0, %0 : vector<8x128xf32>
    %c0_1 = arith.constant 0 : index
    %c0_2 = arith.constant 0 : index
    %2 = vector.load %arg2[%c0_1, %c0_2] : memref<128x128xf32, #tpu.memory_space<vmem>>, vector<128x128xf32>
    %cst = arith.constant dense<0.000000e+00> : vector<8x128xf32>
    %3 = tpu.matmul %1, %2, %cst {dimension_numbers = #tpu.dot_dimension_numbers<[1], [0], [0], [1], [0, 0, 1, 1], [], []>} : vector<8x128xf32>, vector<128x128xf32>, vector<8x128xf32> -> vector<8x128xf32>
    %cst_3 = arith.constant 1.000000e-30 : f32
    %4 = vector.broadcast %cst_3 : f32 to vector<8x128xf32>
    %5 = arith.maximumf %3, %4 : vector<8x128xf32>
    %6 = math.rsqrt %5 : vector<8x128xf32>
    %7 = arith.mulf %0, %6 : vector<8x128xf32>
    %c0_4 = arith.constant 0 : index
    %c0_5 = arith.constant 0 : index
    %8 = vector.load %arg3[%c0_4, %c0_5] : memref<128x2304xf32, #tpu.memory_space<vmem>>, vector<128x2304xf32>
    %cst_6 = arith.constant dense<0.000000e+00> : vector<8x2304xf32>
    %9 = tpu.matmul %7, %8, %cst_6 {dimension_numbers = #tpu.dot_dimension_numbers<[1], [0], [0], [1], [0, 0, 1, 1], [], []>} : vector<8x128xf32>, vector<128x2304xf32>, vector<8x2304xf32> -> vector<8x2304xf32>
    %10 = vector.extract_strided_slice %9 {offsets = [0, 0], sizes = [8, 128], strides = [1, 1]} : vector<8x2304xf32> to vector<8x128xf32>
    %11 = vector.extract_strided_slice %9 {offsets = [0, 128], sizes = [8, 128], strides = [1, 1]} : vector<8x2304xf32> to vector<8x128xf32>
    %12 = vector.extract_strided_slice %9 {offsets = [0, 256], sizes = [8, 512], strides = [1, 1]} : vector<8x2304xf32> to vector<8x512xf32>
    %13 = vector.extract_strided_slice %9 {offsets = [0, 768], sizes = [8, 512], strides = [1, 1]} : vector<8x2304xf32> to vector<8x512xf32>
    %14 = vector.extract_strided_slice %9 {offsets = [0, 1280], sizes = [8, 512], strides = [1, 1]} : vector<8x2304xf32> to vector<8x512xf32>
    %15 = vector.extract_strided_slice %9 {offsets = [0, 1792], sizes = [8, 512], strides = [1, 1]} : vector<8x2304xf32> to vector<8x512xf32>
    %16 = arith.mulf %7, %10 : vector<8x128xf32>
    %c0_7 = arith.constant 0 : index
    %c0_8 = arith.constant 0 : index
    %17 = vector.load %arg4[%c0_7, %c0_8] : memref<128x128xf32, #tpu.memory_space<vmem>>, vector<128x128xf32>
    %cst_9 = arith.constant dense<0.000000e+00> : vector<8x128xf32>
    %18 = tpu.matmul %16, %17, %cst_9 {dimension_numbers = #tpu.dot_dimension_numbers<[1], [0], [0], [1], [0, 0, 1, 1], [], []>} : vector<8x128xf32>, vector<128x128xf32>, vector<8x128xf32> -> vector<8x128xf32>
    %19 = arith.mulf %7, %11 : vector<8x128xf32>
    %c0_10 = arith.constant 0 : index
    %c0_11 = arith.constant 0 : index
    %20 = vector.load %arg4[%c0_10, %c0_11] : memref<128x128xf32, #tpu.memory_space<vmem>>, vector<128x128xf32>
    %cst_12 = arith.constant dense<0.000000e+00> : vector<8x128xf32>
    %21 = tpu.matmul %19, %20, %cst_12 {dimension_numbers = #tpu.dot_dimension_numbers<[1], [0], [0], [1], [0, 0, 1, 1], [], []>} : vector<8x128xf32>, vector<128x128xf32>, vector<8x128xf32> -> vector<8x128xf32>
    %22 = arith.mulf %18, %18 : vector<8x128xf32>
    %23 = arith.mulf %21, %21 : vector<8x128xf32>
    %24 = arith.addf %22, %23 : vector<8x128xf32>
    %25 = math.sqrt %24 : vector<8x128xf32>
    %26 = arith.mulf %12, %12 : vector<8x512xf32>
    %27 = arith.mulf %13, %13 : vector<8x512xf32>
    %28 = arith.addf %26, %27 : vector<8x512xf32>
    %c0_13 = arith.constant 0 : index
    %c0_14 = arith.constant 0 : index
    %29 = vector.load %arg5[%c0_13, %c0_14] : memref<512x128xf32, #tpu.memory_space<vmem>>, vector<512x128xf32>
    %cst_15 = arith.constant dense<0.000000e+00> : vector<8x128xf32>
    %30 = tpu.matmul %28, %29, %cst_15 {dimension_numbers = #tpu.dot_dimension_numbers<[1], [0], [0], [1], [0, 0, 1, 1], [], []>} : vector<8x512xf32>, vector<512x128xf32>, vector<8x128xf32> -> vector<8x128xf32>
    %c0_16 = arith.constant 0 : index
    %c0_17 = arith.constant 0 : index
    %31 = vector.load %arg6[%c0_16, %c0_17] : memref<512x128xf32, #tpu.memory_space<vmem>>, vector<512x128xf32>
    %cst_18 = arith.constant dense<0.000000e+00> : vector<8x128xf32>
    %32 = tpu.matmul %28, %31, %cst_18 {dimension_numbers = #tpu.dot_dimension_numbers<[1], [0], [0], [1], [0, 0, 1, 1], [], []>} : vector<8x512xf32>, vector<512x128xf32>, vector<8x128xf32> -> vector<8x128xf32>
    %33 = tpu.iota {dimensions = array<i32: 1>} : vector<8x128xi32>
    %c7_i32 = arith.constant 7 : i32
    %34 = vector.broadcast %c7_i32 : i32 to vector<8x128xi32>
    %35 = arith.andi %33, %34 : vector<8x128xi32>
    %c1_i32 = arith.constant 1 : i32
    %36 = vector.broadcast %c1_i32 : i32 to vector<8x128xi32>
    %37 = arith.cmpi slt, %35, %36 : vector<8x128xi32>
    %c2_i32 = arith.constant 2 : i32
    %38 = vector.broadcast %c2_i32 : i32 to vector<8x128xi32>
    %39 = arith.cmpi sgt, %35, %38 : vector<8x128xi32>
    %40 = arith.ori %37, %39 : vector<8x128xi1>
    %41 = arith.extui %40 : vector<8x128xi1> to vector<8x128xi32>
    %42 = arith.sitofp %41 : vector<8x128xi32> to vector<8x128xf32>
    %43 = arith.addf %32, %42 : vector<8x128xf32>
    %44 = tpu.reciprocal %43 {approx = true} : vector<8x128xf32> -> vector<8x128xf32>
    %45 = arith.mulf %30, %44 : vector<8x128xf32>
    %46 = arith.mulf %14, %14 : vector<8x512xf32>
    %47 = arith.mulf %15, %15 : vector<8x512xf32>
    %48 = arith.addf %46, %47 : vector<8x512xf32>
    %c0_19 = arith.constant 0 : index
    %c0_20 = arith.constant 0 : index
    %49 = vector.load %arg7[%c0_19, %c0_20] : memref<512x128xf32, #tpu.memory_space<vmem>>, vector<512x128xf32>
    %cst_21 = arith.constant dense<0.000000e+00> : vector<8x128xf32>
    %50 = tpu.matmul %48, %49, %cst_21 {dimension_numbers = #tpu.dot_dimension_numbers<[1], [0], [0], [1], [0, 0, 1, 1], [], []>} : vector<8x512xf32>, vector<512x128xf32>, vector<8x128xf32> -> vector<8x128xf32>
    %51 = arith.addf %25, %45 : vector<8x128xf32>
    %52 = arith.addf %51, %50 : vector<8x128xf32>
    %c0_22 = arith.constant 0 : index
    %c0_23 = arith.constant 0 : index
    %53 = vector.load %arg8[%c0_22, %c0_23] : memref<8x128xf32, #tpu.memory_space<vmem>>, vector<8x128xf32>
    tpu.vector_store %arg8[%c0_22, %c0_23], %52 {strides = array<i32>} : memref<8x128xf32, #tpu.memory_space<vmem>>, vector<8x128xf32>,
    return
  }
  func.func @transform_0(%arg0: i32) -> (i32, i32) {
    %c0_i32 = arith.constant 0 : i32
    %c0_i32_0 = arith.constant 0 : i32
    return %arg0, %c0_i32 : i32, i32
  }
  func.func @transform_1(%arg0: i32) -> (i32, i32) {
    %c0_i32 = arith.constant 0 : i32
    %c0_i32_0 = arith.constant 0 : i32
    %c0_i32_1 = arith.constant 0 : i32
    return %c0_i32, %c0_i32_0 : i32, i32
  }
  func.func @transform_2(%arg0: i32) -> (i32, i32) {
    %c0_i32 = arith.constant 0 : i32
    %c0_i32_0 = arith.constant 0 : i32
    %c0_i32_1 = arith.constant 0 : i32
    return %c0_i32, %c0_i32_0 : i32, i32
  }
  func.func @transform_3(%arg0: i32) -> (i32, i32) {
    %c0_i32 = arith.constant 0 : i32
    %c0_i32_0 = arith.constant 0 : i32
    %c0_i32_1 = arith.constant 0 : i32
    return %c0_i32, %c0_i32_0 : i32, i32
  }
  func.func @transform_4(%arg0: i32) -> (i32, i32) {
    %c0_i32 = arith.constant 0 : i32
    %c0_i32_0 = arith.constant 0 : i32
    %c0_i32_1 = arith.constant 0 : i32
    return %c0_i32, %c0_i32_0 : i32, i32
  }
  func.func @transform_5(%arg0: i32) -> (i32, i32) {
    %c0_i32 = arith.constant 0 : i32
    %c0_i32_0 = arith.constant 0 : i32
    %c0_i32_1 = arith.constant 0 : i32
    return %c0_i32, %c0_i32_0 : i32, i32
  }
  func.func @transform_6(%arg0: i32) -> (i32, i32) {
    %c0_i32 = arith.constant 0 : i32
    %c0_i32_0 = arith.constant 0 : i32
    %c0_i32_1 = arith.constant 0 : i32
    return %c0_i32, %c0_i32_0 : i32, i32
  }
  func.func @transform_7(%arg0: i32) -> (i32, i32) {
    %c0_i32 = arith.constant 0 : i32
    %c0_i32_0 = arith.constant 0 : i32
    return %arg0, %c0_i32 : i32, i32
  }
}

</mosaic_0001>

<bundles_post_ra>
// kernel: qgen_forward.1
= control target key start
LH: loop header
LB: loop body
LE: loop exit
PB: predicated region body
PF: predicated region fallthrough
CT: control target
= control target key end

     0   :  { %12 = vsyncpa [#allocation3], 0  ;;  %s2689_s0 = inlined_call_operand.vmem [shape: f32[8,128], index: 0, kind: input, shape index: {}]   ;;  %s2690_s1 = inlined_call_operand.hbm [shape: f32[128,128], index: 1, kind: input, shape index: {}]   ;;  %s2691_s2 = inlined_call_operand.hbm [shape: f32[128,2304], index: 2, kind: input, shape index: {}]   ;;  %s2692_s3 = inlined_call_operand.hbm [shape: f32[128,128], index: 3, kind: input, shape index: {}]   ;;  %s2693_s4 = inlined_call_operand.hbm [shape: f32[512,128], index: 4, kind: input, shape index: {}]   ;;  %s2694_s5 = inlined_call_operand.hbm [shape: f32[512,128], index: 5, kind: input, shape index: {}]   ;;  %s2695_s6 = inlined_call_operand.hbm [shape: f32[512,128], index: 6, kind: input, shape index: {}]   ;;  %s2696_s7 = inlined_call_operand.vmem [shape: f32[8,128], index: 7, kind: output, shape index: {}]  }
   0x1   :  { %13 = vsyncpa [#allocation5], 0 }
   0x2   :  { %14 = vsyncpa [#allocation8], 0 }
   0x3   :  { %15 = vsyncpa [#allocation11], 0  ;;  %s2464_s24 = smov [#allocation4]  }
   0x4   :  { %s35_s25 = sshll.u32 %s2464_s24, 4  ;;  %s36_s25 = int_to_ptr.vmem [resolvable:$true] %s35_s25 }
   0x5   :  { %s2344_s26 = scalar_lea.vmem %s36_s25, 36864  ;;  %p2349_p1 = scmp.lt.s32.totalorder %s36_s25, %s36_s25 }
   0x6   :  { %p2345_p0 = scmp.ne.s32.totalorder %s36_s25, %s2344_s26  ;;  %p2350_p2 = scmp.lt.s32.totalorder %s2344_s26, %s2344_s26 }
   0x8   :  { %p2351_p3 = por %p2350_p2, %p2349_p1 }
   0xa   :  { %p2352_p4 = pnand %p2351_p3, %p2345_p0 }
   0xc   :  { %2355 = shalt.err (!%p2352_p4)
}
   0xd   :  { %s2465_s27 = smov 2304   ;;  %s2466_s28 = smov 144  }
   0xe   :  { %41 = dma.hbm_to_vmem [thread:$0]  %s2691_s2, 36864, %s36_s25, [#allocation5], %s2465_s27, %s2465_s27, %s2466_s28  }
   0xf   :  { %s2467_s8 = smov [#allocation7]   ;;  %s2468_s10 = smov [#allocation2]  }
  0x10   :  { %s59_s9 = sshll.u32 %s2467_s8, 4  ;;  %s23_s11 = sshll.u32 %s2468_s10, 4  ;;  %s60_s9 = int_to_ptr.vmem [resolvable:$true] %s59_s9  ;;  %s24_s11 = int_to_ptr.vmem [resolvable:$true] %s23_s11 }
  0x11   :  { %s2364_s12 = scalar_lea.vmem %s60_s9, 8192  ;;  %p2369_p6 = scmp.lt.s32.totalorder %s60_s9, %s60_s9 }
  0x12   :  { %p2365_p5 = scmp.ne.s32.totalorder %s60_s9, %s2364_s12  ;;  %p2370_p7 = scmp.lt.s32.totalorder %s2364_s12, %s2364_s12 }
  0x14   :  { %p2371_p8 = por %p2370_p7, %p2369_p6 }
  0x16   :  { %p2372_p9 = pnand %p2371_p8, %p2365_p5 }
  0x18   :  { %2375 = shalt.err (!%p2372_p9)
}
  0x19   :  { %s2469_s13 = smov 128   ;;  %s2470_s14 = smov 8  }
  0x1a   :  { %65 = dma.hbm_to_vmem [thread:$0]  %s2693_s4, 8192, %s60_s9, [#allocation8], %s2469_s13, %s2469_s13, %s2470_s14  }
  0x1b   :  { %s2384_s2 = scalar_lea.vmem %s24_s11, 2048  ;;  %p2389_p11 = scmp.lt.s32.totalorder %s24_s11, %s24_s11 }
  0x1c   :  { %p2385_p10 = scmp.ne.s32.totalorder %s24_s11, %s2384_s2  ;;  %p2390_p12 = scmp.lt.s32.totalorder %s2384_s2, %s2384_s2 }
  0x1e   :  { %p2391_p13 = por %p2390_p12, %p2389_p11 }
  0x20   :  { %p2392_p0 = pnand %p2391_p13, %p2385_p10 }
  0x22   :  { %2395 = shalt.err (!%p2392_p0)
}
  0x23   :  { %29 = dma.hbm_to_vmem [thread:$0]  %s2690_s1, 2048, %s24_s11, [#allocation3], %s2469_s13, %s2469_s13, %s2470_s14  }
  0x24   :  { %s2471_s19 = smov [#allocation6]   ;;  %s2472_s21 = smov [#allocation9]  }
  0x25   :  { %s47_s20 = sshll.u32 %s2471_s19, 4  ;;  %s71_s4 = sshll.u32 %s2472_s21, 4  ;;  %s48_s20 = int_to_ptr.vmem [resolvable:$true] %s47_s20  ;;  %s72_s4 = int_to_ptr.vmem [resolvable:$true] %s71_s4 }
  0x26   :  { %s2404_s22 = scalar_lea.vmem %s48_s20, 2048  ;;  %p2409_p2 = scmp.lt.s32.totalorder %s48_s20, %s48_s20 }
  0x27   :  { %p2405_p1 = scmp.ne.s32.totalorder %s48_s20, %s2404_s22  ;;  %p2410_p3 = scmp.lt.s32.totalorder %s2404_s22, %s2404_s22 }
  0x29   :  { %p2411_p4 = por %p2410_p3, %p2409_p2 }
  0x2b   :  { %p2412_p5 = pnand %p2411_p4, %p2405_p1 }
  0x2d   :  { %2415 = shalt.err (!%p2412_p5)
}
  0x2e   :  { %53 = dma.hbm_to_vmem [thread:$0]  %s2692_s3, 2048, %s48_s20, [#allocation5], %s2469_s13, %s2469_s13, %s2470_s14  }
  0x2f   :  { %s2424_s1 = scalar_lea.vmem %s72_s4, 8192  ;;  %p2429_p7 = scmp.lt.s32.totalorder %s72_s4, %s72_s4 }
  0x30   :  { %p2425_p6 = scmp.ne.s32.totalorder %s72_s4, %s2424_s1  ;;  %p2430_p8 = scmp.lt.s32.totalorder %s2424_s1, %s2424_s1 }
  0x32   :  { %p2431_p9 = por %p2430_p8, %p2429_p7 }
  0x34   :  { %p2432_p10 = pnand %p2431_p9, %p2425_p6 }
  0x36   :  { %2435 = shalt.err (!%p2432_p10)
}
  0x37   :  { %77 = dma.hbm_to_vmem [thread:$0]  %s2694_s5, 8192, %s72_s4, [#allocation8], %s2469_s13, %s2469_s13, %s2470_s14  }
  0x38   :  { %s2473_s27 = smov [#allocation10]  }
  0x39   :  { %s83_s28 = sshll.u32 %s2473_s27, 4  ;;  %s84_s28 = int_to_ptr.vmem [resolvable:$true] %s83_s28 }
  0x3a   :  { %s2444_s29 = scalar_lea.vmem %s84_s28, 8192  ;;  %p2449_p12 = scmp.lt.s32.totalorder %s84_s28, %s84_s28 }
  0x3b   :  { %p2445_p11 = scmp.ne.s32.totalorder %s84_s28, %s2444_s29  ;;  %p2450_p13 = scmp.lt.s32.totalorder %s2444_s29, %s2444_s29 }
  0x3d   :  { %p2451_p0 = por %p2450_p13, %p2449_p12 }
  0x3f   :  { %p2452_p1 = pnand %p2451_p0, %p2445_p11 }
  0x41   :  { %2455 = shalt.err (!%p2452_p1)
}
  0x42   :  { %89 = dma.hbm_to_vmem [thread:$0]  %s2695_s6, 8192, %s84_s28, [#allocation11], %s2469_s13, %s2469_s13, %s2470_s14  }
  0x43   :  { %2456 = dma.done.wait [#allocation3], 2048  }
  0x44   :  { %2457 = vsyncadd [#allocation3], 4294965248 }
  0x45   :  { %2458 = dma.done.wait [#allocation5], 38912  }
  0x46   :  { %2459 = vsyncadd [#allocation5], 4294928384 }
  0x47   :  { %2460 = dma.done.wait [#allocation8], 16384  }
  0x48   :  { %2461 = vsyncadd [#allocation8], 4294950912 }
  0x49   :  { %2462 = dma.done.wait [#allocation11], 8192  }
  0x4a   :  { %2463 = vsyncadd [#allocation11], 4294959104  ;;  %v2474_v0 = vmov 0.0   ;;  %vm2475_vm0 = vmmov 0   ;;  %v125_v1 = vld [vmem:[#allocation2 + $0x78] sm:$0xff]  ;;  %v124_v2 = vld [vmem:[#allocation2 + $0x70] sm:$0xff] }
  0x4b   :  { %2213 = vmatprep.subr.mxu0 %v2474_v0  ;;  %2245 = vmatprep.mubr.msk.f32.mxu0 %vm2475_vm0, %v2474_v0  ;;  %v123_v3 = vld [vmem:[#allocation2 + $0x68] sm:$0xff]  ;;  %v122_v4 = vld [vmem:[#allocation2 + $0x60] sm:$0xff]  ;;  %v470_v5 = vld [vmem:[#allocation4 + $0x878] sm:$0xff] }
  0x4c   :  { %551 = vmatprep.mubr.f32.mxu1 %v2474_v0  ;;  %2214 = vmatpush3.msra.mxu0 %v125_v1  ;;  %v121_v6 = vld [vmem:[#allocation2 + $0x58] sm:$0xff]  ;;  %v469_v7 = vld [vmem:[#allocation4 + $0x870] sm:$0xff]  ;;  %v452_v8 = vld [vmem:[#allocation4 + $0x7e8] sm:$0xff] }
  0x4d   :  { %2215 = vmatprep.subr.mxu0 %v2474_v0  ;;  %487 = vmatprep.subr.mxu1 %v470_v5  ;;  %v451_v9 = vld [vmem:[#allocation4 + $0x7e0] sm:$0xff]  ;;  %v120_v10 = vld [vmem:[#allocation2 + $0x50] sm:$0xff]  ;;  %v434_v11 = vld [vmem:[#allocation4 + $0x758] sm:$0xff] }
  0x4e   :  { %2216 = vmatpush3.msra.mxu0 %v124_v2  ;;  %488 = vmatpush1.msra.mxu1 %v469_v7  ;;  %v433_v12 = vld [vmem:[#allocation4 + $0x750] sm:$0xff]  ;;  %v416_v13 = vld [vmem:[#allocation4 + $0x6c8] sm:$0xff]  ;;  %v415_v15 = vld [vmem:[#allocation4 + $0x6c0] sm:$0xff] }
  0x4f   :  { %2217 = vmatprep.subr.mxu0 %v2474_v0  ;;  %489 = vmatprep.subr.mxu1 %v452_v8  ;;  %v119_v14 = vld [vmem:[#allocation2 + $0x48] sm:$0xff]  ;;  %v398_v16 = vld [vmem:[#allocation4 + $0x638] sm:$0xff]  ;;  %v118_v17 = vld [vmem:[#allocation2 + $0x40] sm:$0xff] }
  0x50   :  { %2218 = vmatpush3.msra.mxu0 %v123_v3  ;;  %490 = vmatpush1.msra.mxu1 %v451_v9  ;;  %v397_v18 = vld [vmem:[#allocation4 + $0x630] sm:$0xff]  ;;  %v380_v19 = vld [vmem:[#allocation4 + $0x5a8] sm:$0xff]  ;;  %v117_v20 = vld [vmem:[#allocation2 + $0x38] sm:$0xff] }
  0x51   :  { %2219 = vmatprep.subr.mxu0 %v2474_v0  ;;  %491 = vmatprep.subr.mxu1 %v434_v11  ;;  %v379_v21 = vld [vmem:[#allocation4 + $0x5a0] sm:$0xff]  ;;  %v362_v22 = vld [vmem:[#allocation4 + $0x518] sm:$0xff]  ;;  %v116_v23 = vld [vmem:[#allocation2 + $0x30] sm:$0xff] }
  0x52   :  { %2220 = vmatpush3.msra.mxu0 %v122_v4  ;;  %492 = vmatpush1.msra.mxu1 %v433_v12  ;;  %v361_v24 = vld [vmem:[#allocation4 + $0x510] sm:$0xff]  ;;  %v115_v25 = vld [vmem:[#allocation2 + $0x28] sm:$0xff]  ;;  %v114_v26 = vld [vmem:[#allocation2 + $0x20] sm:$0xff] }
  0x53   :  { %2221 = vmatprep.subr.mxu0 %v2474_v0  ;;  %493 = vmatprep.subr.mxu1 %v416_v13  ;;  %v113_v27 = vld [vmem:[#allocation2 + $0x18] sm:$0xff]  ;;  %v112_v28 = vld [vmem:[#allocation2 + $0x10] sm:$0xff]  ;;  %v2568_v29 = vld [vmem:[%s2689_s0] sm:$0xff] }
  0x54   :  { %2222 = vmatpush3.msra.mxu0 %v121_v6  ;;  %494 = vmatpush1.msra.mxu1 %v415_v15  ;;  %v111_v30 = vld [vmem:[#allocation2 + $0x8] sm:$0xff]  ;;  %v110_v31 = vld [vmem:[#allocation2] sm:$0xff]  ;;  %v109_v32 = vmul.f32 %v2568_v29, %v2568_v29  ;;  %v454_v35 = vld [vmem:[#allocation4 + $0x7f8] sm:$0xff] }
  0x55   :  { %2223 = vmatprep.subr.mxu0 %v2474_v0  ;;  %495 = vmatprep.subr.mxu1 %v398_v16  ;;  %v472_v33 = vld [vmem:[#allocation4 + $0x888] sm:$0xff]  ;;  %v471_v34 = vld [vmem:[#allocation4 + $0x880] sm:$0xff]  ;;  %v453_v36 = vld [vmem:[#allocation4 + $0x7f0] sm:$0xff] }
  0x56   :  { %2224 = vmatpush3.msra.mxu0 %v120_v10  ;;  %496 = vmatpush1.msra.mxu1 %v397_v18  ;;  %v436_v37 = vld [vmem:[#allocation4 + $0x768] sm:$0xff]  ;;  %v435_v38 = vld [vmem:[#allocation4 + $0x760] sm:$0xff]  ;;  %v418_v39 = vld [vmem:[#allocation4 + $0x6d8] sm:$0xff] }
  0x57   :  { %2225 = vmatprep.subr.mxu0 %v2474_v0  ;;  %497 = vmatprep.subr.mxu1 %v380_v19  ;;  %v417_v40 = vld [vmem:[#allocation4 + $0x6d0] sm:$0xff]  ;;  %v400_v41 = vld [vmem:[#allocation4 + $0x648] sm:$0xff]  ;;  %v399_v42 = vld [vmem:[#allocation4 + $0x640] sm:$0xff] }
  0x58   :  { %2226 = vmatpush3.msra.mxu0 %v119_v14  ;;  %498 = vmatpush1.msra.mxu1 %v379_v21  ;;  %v382_v43 = vld [vmem:[#allocation4 + $0x5b8] sm:$0xff]  ;;  %v381_v44 = vld [vmem:[#allocation4 + $0x5b0] sm:$0xff]  ;;  %v364_v45 = vld [vmem:[#allocation4 + $0x528] sm:$0xff] }
  0x59   :  { %2227 = vmatprep.subr.mxu0 %v2474_v0  ;;  %499 = vmatprep.subr.mxu1 %v362_v22  ;;  %v363_v46 = vld [vmem:[#allocation4 + $0x520] sm:$0xff]  ;;  %v344_v47 = vld [vmem:[#allocation4 + $0x488] sm:$0xff]  ;;  %v346_v48 = vld [vmem:[#allocation4 + $0x498] sm:$0xff] }
  0x5a   :  { %2228 = vmatpush3.msra.mxu0 %v118_v17  ;;  %500 = vmatpush1.msra.mxu1 %v361_v24  ;;  %v343_v49 = vld [vmem:[#allocation4 + $0x480] sm:$0xff]  ;;  %v345_v50 = vld [vmem:[#allocation4 + $0x490] sm:$0xff]  ;;  %v326_v51 = vld [vmem:[#allocation4 + $0x3f8] sm:$0xff] }
  0x5b   :  { %2229 = vmatprep.subr.mxu0 %v2474_v0  ;;  %501 = vmatprep.subr.mxu1 %v344_v47  ;;  %v328_v52 = vld [vmem:[#allocation4 + $0x408] sm:$0xff]  ;;  %v325_v53 = vld [vmem:[#allocation4 + $0x3f0] sm:$0xff]  ;;  %v327_v54 = vld [vmem:[#allocation4 + $0x400] sm:$0xff] }
  0x5c   :  { %2230 = vmatpush3.msra.mxu0 %v117_v20  ;;  %502 = vmatpush1.msra.mxu1 %v343_v49  ;;  %v308_v55 = vld [vmem:[#allocation4 + $0x368] sm:$0xff]  ;;  %v310_v56 = vld [vmem:[#allocation4 + $0x378] sm:$0xff]  ;;  %v307_v57 = vld [vmem:[#allocation4 + $0x360] sm:$0xff] }
  0x5d   :  { %2231 = vmatprep.subr.mxu0 %v2474_v0  ;;  %503 = vmatprep.subr.mxu1 %v326_v51  ;;  %v309_v58 = vld [vmem:[#allocation4 + $0x370] sm:$0xff]  ;;  %v290_v59 = vld [vmem:[#allocation4 + $0x2d8] sm:$0xff]  ;;  %v292_v60 = vld [vmem:[#allocation4 + $0x2e8] sm:$0xff] }
  0x5e   :  { %2232 = vmatpush3.msra.mxu0 %v116_v23  ;;  %504 = vmatpush1.msra.mxu1 %v325_v53  ;;  %v289_v61 = vld [vmem:[#allocation4 + $0x2d0] sm:$0xff]  ;;  %v291_v62 = vld [vmem:[#allocation4 + $0x2e0] sm:$0xff]  ;;  %v272_v63 = vld [vmem:[#allocation4 + $0x248] sm:$0xff] }
  0x5f   :  { %2233 = vmatprep.subr.mxu0 %v2474_v0  ;;  %505 = vmatprep.subr.mxu1 %v308_v55  ;;  %v274_v1 = vld [vmem:[#allocation4 + $0x258] sm:$0xff]  ;;  %v271_v2 = vld [vmem:[#allocation4 + $0x240] sm:$0xff]  ;;  %v273_v3 = vld [vmem:[#allocation4 + $0x250] sm:$0xff] }
  0x60   :  { %2234 = vmatpush3.msra.mxu0 %v115_v25  ;;  %506 = vmatpush1.msra.mxu1 %v307_v57  ;;  %v254_v4 = vld [vmem:[#allocation4 + $0x1b8] sm:$0xff]  ;;  %v256_v5 = vld [vmem:[#allocation4 + $0x1c8] sm:$0xff]  ;;  %v253_v6 = vld [vmem:[#allocation4 + $0x1b0] sm:$0xff] }
  0x61   :  { %2235 = vmatprep.subr.mxu0 %v2474_v0  ;;  %507 = vmatprep.subr.mxu1 %v290_v59  ;;  %v255_v7 = vld [vmem:[#allocation4 + $0x1c0] sm:$0xff]  ;;  %v236_v8 = vld [vmem:[#allocation4 + $0x128] sm:$0xff]  ;;  %v238_v9 = vld [vmem:[#allocation4 + $0x138] sm:$0xff] }
  0x62   :  { %2236 = vmatpush3.msra.mxu0 %v114_v26  ;;  %508 = vmatpush1.msra.mxu1 %v289_v61  ;;  %v235_v10 = vld [vmem:[#allocation4 + $0x120] sm:$0xff]  ;;  %v237_v11 = vld [vmem:[#allocation4 + $0x130] sm:$0xff]  ;;  %v218_v12 = vld [vmem:[#allocation4 + $0x98] sm:$0xff] }
  0x63   :  { %2237 = vmatprep.subr.mxu0 %v2474_v0  ;;  %509 = vmatprep.subr.mxu1 %v272_v63  ;;  %v220_v13 = vld [vmem:[#allocation4 + $0xa8] sm:$0xff]  ;;  %v217_v14 = vld [vmem:[#allocation4 + $0x90] sm:$0xff]  ;;  %v219_v15 = vld [vmem:[#allocation4 + $0xa0] sm:$0xff] }
  0x64   :  { %2238 = vmatpush3.msra.mxu0 %v113_v27  ;;  %510 = vmatpush1.msra.mxu1 %v271_v2  ;;  %v200_v16 = vld [vmem:[#allocation4 + $0x8] sm:$0xff]  ;;  %v202_v17 = vld [vmem:[#allocation4 + $0x18] sm:$0xff]  ;;  %v199_v18 = vld [vmem:[#allocation4] sm:$0xff] }
  0x65   :  { %2239 = vmatprep.subr.mxu0 %v2474_v0  ;;  %511 = vmatprep.subr.mxu1 %v254_v4  ;;  %v201_v19 = vld [vmem:[#allocation4 + $0x10] sm:$0xff]  ;;  %v474_v20 = vld [vmem:[#allocation4 + $0x898] sm:$0xff]  ;;  %v476_v21 = vld [vmem:[#allocation4 + $0x8a8] sm:$0xff] }
  0x66   :  { %2240 = vmatpush3.msra.mxu0 %v112_v28  ;;  %512 = vmatpush1.msra.mxu1 %v253_v6  ;;  %v473_v27 = vld [vmem:[#allocation4 + $0x890] sm:$0xff]  ;;  %v475_v28 = vld [vmem:[#allocation4 + $0x8a0] sm:$0xff]  ;;  %v366_v49 = vld [vmem:[#allocation4 + $0x538] sm:$0xff] }
  0x67   :  { %2241 = vmatprep.subr.mxu0 %v2474_v0  ;;  %513 = vmatprep.subr.mxu1 %v236_v8  ;;  %v383_v47 = vld [vmem:[#allocation4 + $0x5c0] sm:$0xff]  ;;  %v365_v51 = vld [vmem:[#allocation4 + $0x530] sm:$0xff]  ;;  %v348_v53 = vld [vmem:[#allocation4 + $0x4a8] sm:$0xff] }
  0x68   :  { %2242 = vmatpush3.msra.mxu0 %v111_v30  ;;  %514 = vmatpush1.msra.mxu1 %v235_v10  ;;  %v456_v30 = vld [vmem:[#allocation4 + $0x808] sm:$0xff]  ;;  %v347_v55 = vld [vmem:[#allocation4 + $0x4a0] sm:$0xff]  ;;  %v330_v57 = vld [vmem:[#allocation4 + $0x418] sm:$0xff] }
  0x69   :  { %2243 = vmatprep.subr.mxu0 %v2474_v0  ;;  %515 = vmatprep.subr.mxu1 %v218_v12  ;;  %v329_v59 = vld [vmem:[#allocation4 + $0x410] sm:$0xff]  ;;  %v312_v61 = vld [vmem:[#allocation4 + $0x388] sm:$0xff]  ;;  %v311_v63 = vld [vmem:[#allocation4 + $0x380] sm:$0xff] }
  0x6a   :  { %2244 = vmatpush3.msra.mxu0 %v110_v31  ;;  %516 = vmatpush1.msra.mxu1 %v217_v14  ;;  %v458_v31 = vld [vmem:[#allocation4 + $0x818] sm:$0xff]  ;;  %v293_v4 = vld [vmem:[#allocation4 + $0x2f0] sm:$0xff]  ;;  %v276_v6 = vld [vmem:[#allocation4 + $0x268] sm:$0xff] }
  0x6b   :  { %2246 = vmatmul.mubr.f32.vlgmr.msra.gmra.mxu0 %v109_v32  ;;  %558 = vmatprep.subr.mxu0 %v472_v33  ;;  %v455_v32 = vld [vmem:[#allocation4 + $0x800] sm:$0xff]  ;;  %v457_v33 = vld [vmem:[#allocation4 + $0x810] sm:$0xff]  ;;  %v294_v2 = vld [vmem:[#allocation4 + $0x2f8] sm:$0xff] }
  0x6c   :  { %559 = vmatpush1.msra.mxu0 %v471_v34  ;;  %622 = vmatprep.mubr.f32.mxu0 %v2474_v0  ;;  %v438_v34 = vld [vmem:[#allocation4 + $0x778] sm:$0xff]  ;;  %v275_v8 = vld [vmem:[#allocation4 + $0x260] sm:$0xff]  ;;  %v257_v12 = vld [vmem:[#allocation4 + $0x1d0] sm:$0xff] }
  0x6d   :  { %560 = vmatprep.subr.mxu0 %v454_v35  ;;  %517 = vmatprep.subr.mxu1 %v200_v16  ;;  %v440_v35 = vld [vmem:[#allocation4 + $0x788] sm:$0xff]  ;;  %v258_v10 = vld [vmem:[#allocation4 + $0x1d8] sm:$0xff]  ;;  %v239_v16 = vld [vmem:[#allocation4 + $0x140] sm:$0xff] }
  0x6e   :  { %561 = vmatpush1.msra.mxu0 %v453_v36  ;;  %518 = vmatpush1.msra.mxu1 %v199_v18  ;;  %v437_v36 = vld [vmem:[#allocation4 + $0x770] sm:$0xff]  ;;  %v240_v14 = vld [vmem:[#allocation4 + $0x148] sm:$0xff]  ;;  %v222_v18 = vld [vmem:[#allocation4 + $0xb8] sm:$0xff] }
  0x6f   :  { %562 = vmatprep.subr.mxu0 %v436_v37  ;;  %629 = vmatprep.subr.mxu1 %v474_v20  ;;  %v439_v37 = vld [vmem:[#allocation4 + $0x780] sm:$0xff]  ;;  %v221_v20 = vld [vmem:[#allocation4 + $0xb0] sm:$0xff] }
  0x70   :  { %563 = vmatpush1.msra.mxu0 %v435_v38  ;;  %v422_v38 = vld [vmem:[#allocation4 + $0x6f8] sm:$0xff] }
  0x71   :  { %564 = vmatprep.subr.mxu0 %v418_v39  ;;  %v419_v39 = vld [vmem:[#allocation4 + $0x6e0] sm:$0xff] }
  0x72   :  { %565 = vmatpush1.msra.mxu0 %v417_v40  ;;  %v421_v40 = vld [vmem:[#allocation4 + $0x6f0] sm:$0xff] }
  0x73   :  { %566 = vmatprep.subr.mxu0 %v400_v41  ;;  %v402_v41 = vld [vmem:[#allocation4 + $0x658] sm:$0xff] }
  0x74   :  { %567 = vmatpush1.msra.mxu0 %v399_v42  ;;  %v404_v42 = vld [vmem:[#allocation4 + $0x668] sm:$0xff] }
  0x75   :  { %568 = vmatprep.subr.mxu0 %v382_v43  ;;  %v401_v43 = vld [vmem:[#allocation4 + $0x650] sm:$0xff] }
  0x76   :  { %569 = vmatpush1.msra.mxu0 %v381_v44  ;;  %v403_v44 = vld [vmem:[#allocation4 + $0x660] sm:$0xff] }
  0x77   :  { %570 = vmatprep.subr.mxu0 %v364_v45  ;;  %v384_v45 = vld [vmem:[#allocation4 + $0x5c8] sm:$0xff] }
  0x78   :  { %571 = vmatpush1.msra.mxu0 %v363_v46  ;;  %v386_v46 = vld [vmem:[#allocation4 + $0x5d8] sm:$0xff] }
  0x79   :  { %572 = vmatprep.subr.mxu0 %v346_v48  ;;  %v385_v48 = vld [vmem:[#allocation4 + $0x5d0] sm:$0xff] }
  0x7a   :  { %573 = vmatpush1.msra.mxu0 %v345_v50  ;;  %v368_v50 = vld [vmem:[#allocation4 + $0x548] sm:$0xff] }
  0x7b   :  { %574 = vmatprep.subr.mxu0 %v328_v52  ;;  %v367_v52 = vld [vmem:[#allocation4 + $0x540] sm:$0xff] }
  0x7c   :  { %575 = vmatpush1.msra.mxu0 %v327_v54  ;;  %v350_v54 = vld [vmem:[#allocation4 + $0x4b8] sm:$0xff] }
  0x7d   :  { %576 = vmatprep.subr.mxu0 %v310_v56  ;;  %v349_v56 = vld [vmem:[#allocation4 + $0x4b0] sm:$0xff] }
  0x7e   :  { %577 = vmatpush1.msra.mxu0 %v309_v58  ;;  %v332_v58 = vld [vmem:[#allocation4 + $0x428] sm:$0xff] }
  0x7f   :  { %578 = vmatprep.subr.mxu0 %v292_v60  ;;  %v331_v60 = vld [vmem:[#allocation4 + $0x420] sm:$0xff] }
  0x80   :  { %579 = vmatpush1.msra.mxu0 %v291_v62  ;;  %v314_v62 = vld [vmem:[#allocation4 + $0x398] sm:$0xff] }
  0x81   :  { %580 = vmatprep.subr.mxu0 %v274_v1  ;;  %v313_v1 = vld [vmem:[#allocation4 + $0x390] sm:$0xff] }
  0x82   :  { %581 = vmatpush1.msra.mxu0 %v273_v3  ;;  %v296_v3 = vld [vmem:[#allocation4 + $0x308] sm:$0xff] }
  0x83   :  { %582 = vmatprep.subr.mxu0 %v256_v5  ;;  %v295_v5 = vld [vmem:[#allocation4 + $0x300] sm:$0xff] }
  0x84   :  { %583 = vmatpush1.msra.mxu0 %v255_v7  ;;  %v278_v7 = vld [vmem:[#allocation4 + $0x278] sm:$0xff] }
  0x85   :  { %584 = vmatprep.subr.mxu0 %v238_v9  ;;  %v277_v9 = vld [vmem:[#allocation4 + $0x270] sm:$0xff] }
  0x86   :  { %585 = vmatpush1.msra.mxu0 %v237_v11  ;;  %v260_v11 = vld [vmem:[#allocation4 + $0x1e8] sm:$0xff] }
  0x87   :  { %586 = vmatprep.subr.mxu0 %v220_v13  ;;  %v259_v13 = vld [vmem:[#allocation4 + $0x1e0] sm:$0xff] }
  0x88   :  { %587 = vmatpush1.msra.mxu0 %v219_v15  ;;  %v242_v15 = vld [vmem:[#allocation4 + $0x158] sm:$0xff] }
  0x89   :  { %588 = vmatprep.subr.mxu0 %v202_v17  ;;  %v241_v17 = vld [vmem:[#allocation4 + $0x150] sm:$0xff] }
  0x8a   :  { %589 = vmatpush1.msra.mxu0 %v201_v19  ;;  %v224_v19 = vld [vmem:[#allocation4 + $0xc8] sm:$0xff] }
  0x8b   :  { %700 = vmatprep.subr.mxu0 %v476_v21  ;;  %v223_v21 = vld [vmem:[#allocation4 + $0xc0] sm:$0xff] }
 0x12b   :  { %v192_v22 = vpop.f32.mrf.mxu0 }
 0x12c   :  { %v196_v23 = vmax.f32 %v192_v22, 1e-30  ;;  %v204_v22 = vld [vmem:[#allocation4 + $0x28] sm:$0xff] }
 0x12d   :  { %v2247_v24 = vpop.f32.mrf.mxu0 }
 0x12e   :  { %2330 = vrsqrt.f32 %v196_v23  ;;  %v206_v23 = vld [vmem:[#allocation4 + $0x38] sm:$0xff]  ;;  %v203_v24 = vld [vmem:[#allocation4 + $0x20] sm:$0xff] }
 0x13b   :  { %v2331_v25 = vpop.eup %2330 }
 0x13c   :  { %v2577_v26 = vmul.f32 %v2331_v25, %v2568_v29  ;;  %v420_v29 = vld [vmem:[#allocation4 + $0x6e8] sm:$0xff]  ;;  %v205_v25 = vld [vmem:[#allocation4 + $0x30] sm:$0xff] }
 0x13e   :  { %552 = vmatmul.mubr.f32.vlgmr.msra.gmra.mxu1 %v2577_v26  ;;  %623 = vmatmul.mubr.f32.vlgmr.msra.gmra.mxu0 %v2577_v26 }
 0x13f   :  { %630 = vmatpush1.msra.mxu1 %v473_v27  ;;  %701 = vmatpush1.msra.mxu0 %v475_v28  ;;  %v478_v27 = vld [vmem:[#allocation4 + $0x8b8] sm:$0xff]  ;;  %v480_v28 = vld [vmem:[#allocation4 + $0x8c8] sm:$0xff] }
 0x140   :  { %631 = vmatprep.subr.mxu1 %v456_v30  ;;  %702 = vmatprep.subr.mxu0 %v458_v31  ;;  %v477_v30 = vld [vmem:[#allocation4 + $0x8b0] sm:$0xff]  ;;  %v479_v31 = vld [vmem:[#allocation4 + $0x8c0] sm:$0xff] }
 0x141   :  { %632 = vmatpush1.msra.mxu1 %v455_v32  ;;  %703 = vmatpush1.msra.mxu0 %v457_v33  ;;  %v460_v32 = vld [vmem:[#allocation4 + $0x828] sm:$0xff]  ;;  %v462_v33 = vld [vmem:[#allocation4 + $0x838] sm:$0xff] }
 0x142   :  { %633 = vmatprep.subr.mxu1 %v438_v34  ;;  %704 = vmatprep.subr.mxu0 %v440_v35  ;;  %v459_v34 = vld [vmem:[#allocation4 + $0x820] sm:$0xff]  ;;  %v461_v35 = vld [vmem:[#allocation4 + $0x830] sm:$0xff] }
 0x143   :  { %634 = vmatpush1.msra.mxu1 %v437_v36  ;;  %705 = vmatpush1.msra.mxu0 %v439_v37  ;;  %v442_v36 = vld [vmem:[#allocation4 + $0x798] sm:$0xff]  ;;  %v444_v37 = vld [vmem:[#allocation4 + $0x7a8] sm:$0xff] }
 0x144   :  { %635 = vmatprep.subr.mxu1 %v420_v29  ;;  %706 = vmatprep.subr.mxu0 %v422_v38  ;;  %v441_v29 = vld [vmem:[#allocation4 + $0x790] sm:$0xff]  ;;  %v443_v38 = vld [vmem:[#allocation4 + $0x7a0] sm:$0xff] }
 0x145   :  { %636 = vmatpush1.msra.mxu1 %v419_v39  ;;  %707 = vmatpush1.msra.mxu0 %v421_v40  ;;  %v424_v39 = vld [vmem:[#allocation4 + $0x708] sm:$0xff]  ;;  %v426_v40 = vld [vmem:[#allocation4 + $0x718] sm:$0xff] }
 0x146   :  { %637 = vmatprep.subr.mxu1 %v402_v41  ;;  %708 = vmatprep.subr.mxu0 %v404_v42  ;;  %v423_v41 = vld [vmem:[#allocation4 + $0x700] sm:$0xff]  ;;  %v425_v42 = vld [vmem:[#allocation4 + $0x710] sm:$0xff] }
 0x147   :  { %638 = vmatpush1.msra.mxu1 %v401_v43  ;;  %709 = vmatpush1.msra.mxu0 %v403_v44  ;;  %v406_v43 = vld [vmem:[#allocation4 + $0x678] sm:$0xff]  ;;  %v408_v44 = vld [vmem:[#allocation4 + $0x688] sm:$0xff] }
 0x148   :  { %639 = vmatprep.subr.mxu1 %v384_v45  ;;  %710 = vmatprep.subr.mxu0 %v386_v46  ;;  %v405_v45 = vld [vmem:[#allocation4 + $0x670] sm:$0xff]  ;;  %v407_v46 = vld [vmem:[#allocation4 + $0x680] sm:$0xff] }
 0x149   :  { %640 = vmatpush1.msra.mxu1 %v383_v47  ;;  %711 = vmatpush1.msra.mxu0 %v385_v48  ;;  %v388_v47 = vld [vmem:[#allocation4 + $0x5e8] sm:$0xff]  ;;  %v390_v48 = vld [vmem:[#allocation4 + $0x5f8] sm:$0xff] }
 0x14a   :  { %641 = vmatprep.subr.mxu1 %v366_v49  ;;  %712 = vmatprep.subr.mxu0 %v368_v50  ;;  %v387_v49 = vld [vmem:[#allocation4 + $0x5e0] sm:$0xff]  ;;  %v389_v50 = vld [vmem:[#allocation4 + $0x5f0] sm:$0xff] }
 0x14b   :  { %642 = vmatpush1.msra.mxu1 %v365_v51  ;;  %713 = vmatpush1.msra.mxu0 %v367_v52  ;;  %v370_v51 = vld [vmem:[#allocation4 + $0x558] sm:$0xff]  ;;  %v372_v52 = vld [vmem:[#allocation4 + $0x568] sm:$0xff] }
 0x14c   :  { %643 = vmatprep.subr.mxu1 %v348_v53  ;;  %714 = vmatprep.subr.mxu0 %v350_v54  ;;  %v369_v53 = vld [vmem:[#allocation4 + $0x550] sm:$0xff]  ;;  %v371_v54 = vld [vmem:[#allocation4 + $0x560] sm:$0xff] }
 0x14d   :  { %644 = vmatpush1.msra.mxu1 %v347_v55  ;;  %715 = vmatpush1.msra.mxu0 %v349_v56  ;;  %v352_v55 = vld [vmem:[#allocation4 + $0x4c8] sm:$0xff]  ;;  %v354_v56 = vld [vmem:[#allocation4 + $0x4d8] sm:$0xff] }
 0x14e   :  { %645 = vmatprep.subr.mxu1 %v330_v57  ;;  %716 = vmatprep.subr.mxu0 %v332_v58  ;;  %v351_v57 = vld [vmem:[#allocation4 + $0x4c0] sm:$0xff]  ;;  %v353_v58 = vld [vmem:[#allocation4 + $0x4d0] sm:$0xff] }
 0x14f   :  { %646 = vmatpush1.msra.mxu1 %v329_v59  ;;  %717 = vmatpush1.msra.mxu0 %v331_v60  ;;  %v334_v59 = vld [vmem:[#allocation4 + $0x438] sm:$0xff]  ;;  %v336_v60 = vld [vmem:[#allocation4 + $0x448] sm:$0xff] }
 0x150   :  { %647 = vmatprep.subr.mxu1 %v312_v61  ;;  %718 = vmatprep.subr.mxu0 %v314_v62  ;;  %v333_v61 = vld [vmem:[#allocation4 + $0x430] sm:$0xff]  ;;  %v335_v62 = vld [vmem:[#allocation4 + $0x440] sm:$0xff] }
 0x151   :  { %648 = vmatpush1.msra.mxu1 %v311_v63  ;;  %719 = vmatpush1.msra.mxu0 %v313_v1  ;;  %v316_v63 = vld [vmem:[#allocation4 + $0x3a8] sm:$0xff]  ;;  %v318_v1 = vld [vmem:[#allocation4 + $0x3b8] sm:$0xff] }
 0x152   :  { %649 = vmatprep.subr.mxu1 %v294_v2  ;;  %720 = vmatprep.subr.mxu0 %v296_v3  ;;  %v315_v2 = vld [vmem:[#allocation4 + $0x3a0] sm:$0xff]  ;;  %v317_v3 = vld [vmem:[#allocation4 + $0x3b0] sm:$0xff] }
 0x153   :  { %650 = vmatpush1.msra.mxu1 %v293_v4  ;;  %721 = vmatpush1.msra.mxu0 %v295_v5  ;;  %v298_v4 = vld [vmem:[#allocation4 + $0x318] sm:$0xff]  ;;  %v300_v5 = vld [vmem:[#allocation4 + $0x328] sm:$0xff] }
 0x154   :  { %651 = vmatprep.subr.mxu1 %v276_v6  ;;  %722 = vmatprep.subr.mxu0 %v278_v7  ;;  %v297_v6 = vld [vmem:[#allocation4 + $0x310] sm:$0xff]  ;;  %v299_v7 = vld [vmem:[#allocation4 + $0x320] sm:$0xff] }
 0x155   :  { %652 = vmatpush1.msra.mxu1 %v275_v8  ;;  %723 = vmatpush1.msra.mxu0 %v277_v9  ;;  %v280_v8 = vld [vmem:[#allocation4 + $0x288] sm:$0xff]  ;;  %v282_v9 = vld [vmem:[#allocation4 + $0x298] sm:$0xff] }
 0x156   :  { %653 = vmatprep.subr.mxu1 %v258_v10  ;;  %724 = vmatprep.subr.mxu0 %v260_v11  ;;  %v279_v10 = vld [vmem:[#allocation4 + $0x280] sm:$0xff]  ;;  %v281_v11 = vld [vmem:[#allocation4 + $0x290] sm:$0xff] }
 0x157   :  { %654 = vmatpush1.msra.mxu1 %v257_v12  ;;  %725 = vmatpush1.msra.mxu0 %v259_v13  ;;  %v262_v12 = vld [vmem:[#allocation4 + $0x1f8] sm:$0xff]  ;;  %v264_v13 = vld [vmem:[#allocation4 + $0x208] sm:$0xff] }
 0x158   :  { %655 = vmatprep.subr.mxu1 %v240_v14  ;;  %726 = vmatprep.subr.mxu0 %v242_v15  ;;  %v261_v14 = vld [vmem:[#allocation4 + $0x1f0] sm:$0xff]  ;;  %v263_v15 = vld [vmem:[#allocation4 + $0x200] sm:$0xff] }
 0x159   :  { %656 = vmatpush1.msra.mxu1 %v239_v16  ;;  %727 = vmatpush1.msra.mxu0 %v241_v17  ;;  %v244_v16 = vld [vmem:[#allocation4 + $0x168] sm:$0xff]  ;;  %v246_v17 = vld [vmem:[#allocation4 + $0x178] sm:$0xff] }
 0x15a   :  { %657 = vmatprep.subr.mxu1 %v222_v18  ;;  %728 = vmatprep.subr.mxu0 %v224_v19  ;;  %v243_v18 = vld [vmem:[#allocation4 + $0x160] sm:$0xff]  ;;  %v245_v19 = vld [vmem:[#allocation4 + $0x170] sm:$0xff] }
 0x15b   :  { %658 = vmatpush1.msra.mxu1 %v221_v20  ;;  %729 = vmatpush1.msra.mxu0 %v223_v21  ;;  %v226_v20 = vld [vmem:[#allocation4 + $0xd8] sm:$0xff]  ;;  %v228_v21 = vld [vmem:[#allocation4 + $0xe8] sm:$0xff] }
 0x15c   :  { %659 = vmatprep.subr.mxu1 %v204_v22  ;;  %730 = vmatprep.subr.mxu0 %v206_v23  ;;  %v225_v22 = vld [vmem:[#allocation4 + $0xd0] sm:$0xff]  ;;  %v227_v23 = vld [vmem:[#allocation4 + $0xe0] sm:$0xff] }
 0x15d   :  { %660 = vmatpush1.msra.mxu1 %v203_v24  ;;  %693 = vmatprep.mubr.f32.mxu1 %v2474_v0  ;;  %v208_v24 = vld [vmem:[#allocation4 + $0x48] sm:$0xff] }
 0x15e   :  { %731 = vmatpush1.msra.mxu0 %v205_v25  ;;  %764 = vmatprep.mubr.f32.mxu0 %v2474_v0  ;;  %v210_v25 = vld [vmem:[#allocation4 + $0x58] sm:$0xff] }
 0x15f   :  { %694 = vmatmul.mubr.f32.vlgmr.msra.gmra.mxu1 %v2577_v26  ;;  %765 = vmatmul.mubr.f32.vlgmr.msra.gmra.mxu0 %v2577_v26 }
 0x160   :  { %771 = vmatprep.subr.mxu1 %v478_v27  ;;  %842 = vmatprep.subr.mxu0 %v480_v28  ;;  %v207_v27 = vld [vmem:[#allocation4 + $0x40] sm:$0xff]  ;;  %v209_v28 = vld [vmem:[#allocation4 + $0x50] sm:$0xff] }
 0x161   :  { %772 = vmatpush1.msra.mxu1 %v477_v30  ;;  %843 = vmatpush1.msra.mxu0 %v479_v31  ;;  %v482_v30 = vld [vmem:[#allocation4 + $0x8d8] sm:$0xff]  ;;  %v484_v31 = vld [vmem:[#allocation4 + $0x8e8] sm:$0xff] }
 0x162   :  { %773 = vmatprep.subr.mxu1 %v460_v32  ;;  %844 = vmatprep.subr.mxu0 %v462_v33  ;;  %v481_v32 = vld [vmem:[#allocation4 + $0x8d0] sm:$0xff]  ;;  %v483_v33 = vld [vmem:[#allocation4 + $0x8e0] sm:$0xff] }
 0x163   :  { %774 = vmatpush1.msra.mxu1 %v459_v34  ;;  %845 = vmatpush1.msra.mxu0 %v461_v35  ;;  %v464_v34 = vld [vmem:[#allocation4 + $0x848] sm:$0xff]  ;;  %v466_v35 = vld [vmem:[#allocation4 + $0x858] sm:$0xff] }
 0x164   :  { %775 = vmatprep.subr.mxu1 %v442_v36  ;;  %846 = vmatprep.subr.mxu0 %v444_v37  ;;  %v463_v36 = vld [vmem:[#allocation4 + $0x840] sm:$0xff]  ;;  %v465_v37 = vld [vmem:[#allocation4 + $0x850] sm:$0xff] }
 0x165   :  { %776 = vmatpush1.msra.mxu1 %v441_v29  ;;  %847 = vmatpush1.msra.mxu0 %v443_v38  ;;  %v446_v29 = vld [vmem:[#allocation4 + $0x7b8] sm:$0xff]  ;;  %v448_v38 = vld [vmem:[#allocation4 + $0x7c8] sm:$0xff] }
 0x166   :  { %777 = vmatprep.subr.mxu1 %v424_v39  ;;  %848 = vmatprep.subr.mxu0 %v426_v40  ;;  %v445_v39 = vld [vmem:[#allocation4 + $0x7b0] sm:$0xff]  ;;  %v447_v40 = vld [vmem:[#allocation4 + $0x7c0] sm:$0xff] }
 0x167   :  { %778 = vmatpush1.msra.mxu1 %v423_v41  ;;  %849 = vmatpush1.msra.mxu0 %v425_v42  ;;  %v428_v41 = vld [vmem:[#allocation4 + $0x728] sm:$0xff]  ;;  %v430_v42 = vld [vmem:[#allocation4 + $0x738] sm:$0xff] }
 0x168   :  { %779 = vmatprep.subr.mxu1 %v406_v43  ;;  %850 = vmatprep.subr.mxu0 %v408_v44  ;;  %v427_v43 = vld [vmem:[#allocation4 + $0x720] sm:$0xff]  ;;  %v429_v44 = vld [vmem:[#allocation4 + $0x730] sm:$0xff] }
 0x169   :  { %780 = vmatpush1.msra.mxu1 %v405_v45  ;;  %851 = vmatpush1.msra.mxu0 %v407_v46  ;;  %v410_v45 = vld [vmem:[#allocation4 + $0x698] sm:$0xff]  ;;  %v412_v46 = vld [vmem:[#allocation4 + $0x6a8] sm:$0xff] }
 0x16a   :  { %781 = vmatprep.subr.mxu1 %v388_v47  ;;  %852 = vmatprep.subr.mxu0 %v390_v48  ;;  %v409_v47 = vld [vmem:[#allocation4 + $0x690] sm:$0xff]  ;;  %v411_v48 = vld [vmem:[#allocation4 + $0x6a0] sm:$0xff] }
 0x16b   :  { %782 = vmatpush1.msra.mxu1 %v387_v49  ;;  %853 = vmatpush1.msra.mxu0 %v389_v50  ;;  %v392_v49 = vld [vmem:[#allocation4 + $0x608] sm:$0xff]  ;;  %v394_v50 = vld [vmem:[#allocation4 + $0x618] sm:$0xff] }
 0x16c   :  { %783 = vmatprep.subr.mxu1 %v370_v51  ;;  %854 = vmatprep.subr.mxu0 %v372_v52  ;;  %v391_v51 = vld [vmem:[#allocation4 + $0x600] sm:$0xff]  ;;  %v393_v52 = vld [vmem:[#allocation4 + $0x610] sm:$0xff] }
 0x16d   :  { %784 = vmatpush1.msra.mxu1 %v369_v53  ;;  %855 = vmatpush1.msra.mxu0 %v371_v54  ;;  %v374_v53 = vld [vmem:[#allocation4 + $0x578] sm:$0xff]  ;;  %v376_v54 = vld [vmem:[#allocation4 + $0x588] sm:$0xff] }
 0x16e   :  { %785 = vmatprep.subr.mxu1 %v352_v55  ;;  %856 = vmatprep.subr.mxu0 %v354_v56  ;;  %v373_v55 = vld [vmem:[#allocation4 + $0x570] sm:$0xff]  ;;  %v375_v56 = vld [vmem:[#allocation4 + $0x580] sm:$0xff] }
 0x16f   :  { %786 = vmatpush1.msra.mxu1 %v351_v57  ;;  %857 = vmatpush1.msra.mxu0 %v353_v58  ;;  %v356_v57 = vld [vmem:[#allocation4 + $0x4e8] sm:$0xff]  ;;  %v358_v58 = vld [vmem:[#allocation4 + $0x4f8] sm:$0xff] }
 0x170   :  { %787 = vmatprep.subr.mxu1 %v334_v59  ;;  %858 = vmatprep.subr.mxu0 %v336_v60  ;;  %v355_v59 = vld [vmem:[#allocation4 + $0x4e0] sm:$0xff]  ;;  %v357_v60 = vld [vmem:[#allocation4 + $0x4f0] sm:$0xff] }
 0x171   :  { %788 = vmatpush1.msra.mxu1 %v333_v61  ;;  %859 = vmatpush1.msra.mxu0 %v335_v62  ;;  %v338_v61 = vld [vmem:[#allocation4 + $0x458] sm:$0xff]  ;;  %v340_v62 = vld [vmem:[#allocation4 + $0x468] sm:$0xff] }
 0x172   :  { %789 = vmatprep.subr.mxu1 %v316_v63  ;;  %860 = vmatprep.subr.mxu0 %v318_v1  ;;  %v337_v63 = vld [vmem:[#allocation4 + $0x450] sm:$0xff]  ;;  %v339_v1 = vld [vmem:[#allocation4 + $0x460] sm:$0xff] }
 0x173   :  { %790 = vmatpush1.msra.mxu1 %v315_v2  ;;  %861 = vmatpush1.msra.mxu0 %v317_v3  ;;  %v320_v2 = vld [vmem:[#allocation4 + $0x3c8] sm:$0xff]  ;;  %v322_v3 = vld [vmem:[#allocation4 + $0x3d8] sm:$0xff] }
 0x174   :  { %791 = vmatprep.subr.mxu1 %v298_v4  ;;  %862 = vmatprep.subr.mxu0 %v300_v5  ;;  %v319_v4 = vld [vmem:[#allocation4 + $0x3c0] sm:$0xff]  ;;  %v321_v5 = vld [vmem:[#allocation4 + $0x3d0] sm:$0xff] }
 0x175   :  { %792 = vmatpush1.msra.mxu1 %v297_v6  ;;  %863 = vmatpush1.msra.mxu0 %v299_v7  ;;  %v302_v6 = vld [vmem:[#allocation4 + $0x338] sm:$0xff]  ;;  %v304_v7 = vld [vmem:[#allocation4 + $0x348] sm:$0xff] }
 0x176   :  { %793 = vmatprep.subr.mxu1 %v280_v8  ;;  %864 = vmatprep.subr.mxu0 %v282_v9  ;;  %v301_v8 = vld [vmem:[#allocation4 + $0x330] sm:$0xff]  ;;  %v303_v9 = vld [vmem:[#allocation4 + $0x340] sm:$0xff] }
 0x177   :  { %794 = vmatpush1.msra.mxu1 %v279_v10  ;;  %865 = vmatpush1.msra.mxu0 %v281_v11  ;;  %v284_v10 = vld [vmem:[#allocation4 + $0x2a8] sm:$0xff]  ;;  %v286_v11 = vld [vmem:[#allocation4 + $0x2b8] sm:$0xff] }
 0x178   :  { %795 = vmatprep.subr.mxu1 %v262_v12  ;;  %866 = vmatprep.subr.mxu0 %v264_v13  ;;  %v283_v12 = vld [vmem:[#allocation4 + $0x2a0] sm:$0xff]  ;;  %v285_v13 = vld [vmem:[#allocation4 + $0x2b0] sm:$0xff] }
 0x179   :  { %796 = vmatpush1.msra.mxu1 %v261_v14  ;;  %867 = vmatpush1.msra.mxu0 %v263_v15  ;;  %v266_v14 = vld [vmem:[#allocation4 + $0x218] sm:$0xff]  ;;  %v268_v15 = vld [vmem:[#allocation4 + $0x228] sm:$0xff] }
 0x17a   :  { %797 = vmatprep.subr.mxu1 %v244_v16  ;;  %868 = vmatprep.subr.mxu0 %v246_v17  ;;  %v265_v16 = vld [vmem:[#allocation4 + $0x210] sm:$0xff]  ;;  %v267_v17 = vld [vmem:[#allocation4 + $0x220] sm:$0xff] }
 0x17b   :  { %798 = vmatpush1.msra.mxu1 %v243_v18  ;;  %869 = vmatpush1.msra.mxu0 %v245_v19  ;;  %v248_v18 = vld [vmem:[#allocation4 + $0x188] sm:$0xff]  ;;  %v250_v19 = vld [vmem:[#allocation4 + $0x198] sm:$0xff] }
 0x17c   :  { %799 = vmatprep.subr.mxu1 %v226_v20  ;;  %870 = vmatprep.subr.mxu0 %v228_v21  ;;  %v247_v20 = vld [vmem:[#allocation4 + $0x180] sm:$0xff]  ;;  %v249_v21 = vld [vmem:[#allocation4 + $0x190] sm:$0xff] }
 0x17d   :  { %800 = vmatpush1.msra.mxu1 %v225_v22  ;;  %871 = vmatpush1.msra.mxu0 %v227_v23  ;;  %v230_v22 = vld [vmem:[#allocation4 + $0xf8] sm:$0xff]  ;;  %v232_v23 = vld [vmem:[#allocation4 + $0x108] sm:$0xff] }
 0x17e   :  { %801 = vmatprep.subr.mxu1 %v208_v24  ;;  %872 = vmatprep.subr.mxu0 %v210_v25  ;;  %v229_v24 = vld [vmem:[#allocation4 + $0xf0] sm:$0xff]  ;;  %v231_v25 = vld [vmem:[#allocation4 + $0x100] sm:$0xff] }
 0x17f   :  { %802 = vmatpush1.msra.mxu1 %v207_v27  ;;  %835 = vmatprep.mubr.f32.mxu1 %v2474_v0  ;;  %v212_v27 = vld [vmem:[#allocation4 + $0x68] sm:$0xff] }
 0x180   :  { %873 = vmatpush1.msra.mxu0 %v209_v28  ;;  %906 = vmatprep.mubr.f32.mxu0 %v2474_v0  ;;  %v214_v28 = vld [vmem:[#allocation4 + $0x78] sm:$0xff] }
 0x181   :  { %836 = vmatmul.mubr.f32.vlgmr.msra.gmra.mxu1 %v2577_v26  ;;  %907 = vmatmul.mubr.f32.vlgmr.msra.gmra.mxu0 %v2577_v26 }
 0x182   :  { %913 = vmatprep.subr.mxu1 %v482_v30  ;;  %984 = vmatprep.subr.mxu0 %v484_v31  ;;  %v211_v30 = vld [vmem:[#allocation4 + $0x60] sm:$0xff]  ;;  %v213_v31 = vld [vmem:[#allocation4 + $0x70] sm:$0xff] }
 0x183   :  { %914 = vmatpush1.msra.mxu1 %v481_v32  ;;  %985 = vmatpush1.msra.mxu0 %v483_v33  ;;  %v486_v32 = vld [vmem:[#allocation4 + $0x8f8] sm:$0xff]  ;;  %v485_v33 = vld [vmem:[#allocation4 + $0x8f0] sm:$0xff] }
 0x184   :  { %915 = vmatprep.subr.mxu1 %v464_v34  ;;  %986 = vmatprep.subr.mxu0 %v466_v35  ;;  %v468_v34 = vld [vmem:[#allocation4 + $0x868] sm:$0xff]  ;;  %v2593_v35 = vld [vmem:[#allocation6 + $0x78] sm:$0xff] }
 0x185   :  { %916 = vmatpush1.msra.mxu1 %v463_v36  ;;  %987 = vmatpush1.msra.mxu0 %v465_v37  ;;  %v467_v36 = vld [vmem:[#allocation4 + $0x860] sm:$0xff]  ;;  %v450_v37 = vld [vmem:[#allocation4 + $0x7d8] sm:$0xff] }
 0x186   :  { %917 = vmatprep.subr.mxu1 %v446_v29  ;;  %988 = vmatprep.subr.mxu0 %v448_v38  ;;  %v2597_v29 = vld [vmem:[#allocation6 + $0x70] sm:$0xff] }
 0x187   :  { %918 = vmatpush1.msra.mxu1 %v445_v39  ;;  %989 = vmatpush1.msra.mxu0 %v447_v40  ;;  %v449_v38 = vld [vmem:[#allocation4 + $0x7d0] sm:$0xff]  ;;  %v432_v39 = vld [vmem:[#allocation4 + $0x748] sm:$0xff] }
 0x188   :  { %919 = vmatprep.subr.mxu1 %v428_v41  ;;  %990 = vmatprep.subr.mxu0 %v430_v42  ;;  %v2601_v40 = vld [vmem:[#allocation6 + $0x68] sm:$0xff]  ;;  %v431_v41 = vld [vmem:[#allocation4 + $0x740] sm:$0xff]  ;;  %v414_v42 = vld [vmem:[#allocation4 + $0x6b8] sm:$0xff] }
 0x189   :  { %920 = vmatpush1.msra.mxu1 %v427_v43  ;;  %991 = vmatpush1.msra.mxu0 %v429_v44  ;;  %v2605_v43 = vld [vmem:[#allocation6 + $0x60] sm:$0xff]  ;;  %v413_v44 = vld [vmem:[#allocation4 + $0x6b0] sm:$0xff] }
 0x18a   :  { %921 = vmatprep.subr.mxu1 %v410_v45  ;;  %992 = vmatprep.subr.mxu0 %v412_v46  ;;  %v396_v45 = vld [vmem:[#allocation4 + $0x628] sm:$0xff]  ;;  %v2609_v46 = vld [vmem:[#allocation6 + $0x58] sm:$0xff] }
 0x18b   :  { %922 = vmatpush1.msra.mxu1 %v409_v47  ;;  %993 = vmatpush1.msra.mxu0 %v411_v48  ;;  %v395_v47 = vld [vmem:[#allocation4 + $0x620] sm:$0xff]  ;;  %v378_v48 = vld [vmem:[#allocation4 + $0x598] sm:$0xff] }
 0x18c   :  { %923 = vmatprep.subr.mxu1 %v392_v49  ;;  %994 = vmatprep.subr.mxu0 %v394_v50  ;;  %v2613_v49 = vld [vmem:[#allocation6 + $0x50] sm:$0xff] }
 0x18d   :  { %924 = vmatpush1.msra.mxu1 %v391_v51  ;;  %995 = vmatpush1.msra.mxu0 %v393_v52  ;;  %v377_v50 = vld [vmem:[#allocation4 + $0x590] sm:$0xff]  ;;  %v360_v51 = vld [vmem:[#allocation4 + $0x508] sm:$0xff] }
 0x18e   :  { %925 = vmatprep.subr.mxu1 %v374_v53  ;;  %996 = vmatprep.subr.mxu0 %v376_v54  ;;  %v2617_v52 = vld [vmem:[#allocation6 + $0x48] sm:$0xff]  ;;  %v359_v53 = vld [vmem:[#allocation4 + $0x500] sm:$0xff]  ;;  %v342_v54 = vld [vmem:[#allocation4 + $0x478] sm:$0xff] }
 0x18f   :  { %926 = vmatpush1.msra.mxu1 %v373_v55  ;;  %997 = vmatpush1.msra.mxu0 %v375_v56  ;;  %v2621_v55 = vld [vmem:[#allocation6 + $0x40] sm:$0xff]  ;;  %v341_v56 = vld [vmem:[#allocation4 + $0x470] sm:$0xff] }
 0x190   :  { %927 = vmatprep.subr.mxu1 %v356_v57  ;;  %998 = vmatprep.subr.mxu0 %v358_v58  ;;  %v324_v57 = vld [vmem:[#allocation4 + $0x3e8] sm:$0xff]  ;;  %v2625_v58 = vld [vmem:[#allocation6 + $0x38] sm:$0xff] }
 0x191   :  { %928 = vmatpush1.msra.mxu1 %v355_v59  ;;  %999 = vmatpush1.msra.mxu0 %v357_v60  ;;  %v323_v59 = vld [vmem:[#allocation4 + $0x3e0] sm:$0xff]  ;;  %v306_v60 = vld [vmem:[#allocation4 + $0x358] sm:$0xff] }
 0x192   :  { %929 = vmatprep.subr.mxu1 %v338_v61  ;;  %1000 = vmatprep.subr.mxu0 %v340_v62  ;;  %v2629_v61 = vld [vmem:[#allocation6 + $0x30] sm:$0xff] }
 0x193   :  { %930 = vmatpush1.msra.mxu1 %v337_v63  ;;  %1001 = vmatpush1.msra.mxu0 %v339_v1  ;;  %v305_v62 = vld [vmem:[#allocation4 + $0x350] sm:$0xff]  ;;  %v288_v63 = vld [vmem:[#allocation4 + $0x2c8] sm:$0xff] }
 0x194   :  { %931 = vmatprep.subr.mxu1 %v320_v2  ;;  %1002 = vmatprep.subr.mxu0 %v322_v3  ;;  %v2633_v1 = vld [vmem:[#allocation6 + $0x28] sm:$0xff]  ;;  %v287_v2 = vld [vmem:[#allocation4 + $0x2c0] sm:$0xff]  ;;  %v270_v3 = vld [vmem:[#allocation4 + $0x238] sm:$0xff] }
 0x195   :  { %932 = vmatpush1.msra.mxu1 %v319_v4  ;;  %1003 = vmatpush1.msra.mxu0 %v321_v5  ;;  %v1131_v4 = vld [vmem:[#allocation6 + $0x20] sm:$0xff]  ;;  %v269_v5 = vld [vmem:[#allocation4 + $0x230] sm:$0xff] }
 0x196   :  { %933 = vmatprep.subr.mxu1 %v302_v6  ;;  %1004 = vmatprep.subr.mxu0 %v304_v7  ;;  %v252_v6 = vld [vmem:[#allocation4 + $0x1a8] sm:$0xff]  ;;  %v1130_v7 = vld [vmem:[#allocation6 + $0x18] sm:$0xff] }
 0x197   :  { %934 = vmatpush1.msra.mxu1 %v301_v8  ;;  %1005 = vmatpush1.msra.mxu0 %v303_v9  ;;  %v251_v8 = vld [vmem:[#allocation4 + $0x1a0] sm:$0xff]  ;;  %v234_v9 = vld [vmem:[#allocation4 + $0x118] sm:$0xff] }
 0x198   :  { %935 = vmatprep.subr.mxu1 %v284_v10  ;;  %1006 = vmatprep.subr.mxu0 %v286_v11  ;;  %v1129_v10 = vld [vmem:[#allocation6 + $0x10] sm:$0xff] }
 0x199   :  { %936 = vmatpush1.msra.mxu1 %v283_v12  ;;  %1007 = vmatpush1.msra.mxu0 %v285_v13  ;;  %v233_v11 = vld [vmem:[#allocation4 + $0x110] sm:$0xff]  ;;  %v216_v12 = vld [vmem:[#allocation4 + $0x88] sm:$0xff] }
 0x19a   :  { %937 = vmatprep.subr.mxu1 %v266_v14  ;;  %1008 = vmatprep.subr.mxu0 %v268_v15  ;;  %v1128_v13 = vld [vmem:[#allocation6 + $0x8] sm:$0xff]  ;;  %v215_v14 = vld [vmem:[#allocation4 + $0x80] sm:$0xff] }
 0x19b   :  { %938 = vmatpush1.msra.mxu1 %v265_v16  ;;  %1009 = vmatpush1.msra.mxu0 %v267_v17  ;;  %v1127_v15 = vld [vmem:[#allocation6] sm:$0xff]  ;;  %v1337_v16 = vld [vmem:[#allocation7 + $0xf8] sm:$0xff] }
 0x19c   :  { %939 = vmatprep.subr.mxu1 %v248_v18  ;;  %1010 = vmatprep.subr.mxu0 %v250_v19  ;;  %v1369_v17 = vld [vmem:[#allocation7 + $0x1f8] sm:$0xff] }
 0x19d   :  { %940 = vmatpush1.msra.mxu1 %v247_v20  ;;  %1011 = vmatpush1.msra.mxu0 %v249_v21  ;;  %v1321_v20 = vld [vmem:[#allocation7 + $0x78] sm:$0xff] }
 0x19e   :  { %941 = vmatprep.subr.mxu1 %v230_v22  ;;  %1012 = vmatprep.subr.mxu0 %v232_v23  ;;  %v1336_v22 = vld [vmem:[#allocation7 + $0xf0] sm:$0xff] }
 0x19f   :  { %942 = vmatpush1.msra.mxu1 %v229_v24  ;;  %1013 = vmatpush1.msra.mxu0 %v231_v25  ;;  %v1320_v24 = vld [vmem:[#allocation7 + $0x70] sm:$0xff]  ;;  %v1353_v25 = vld [vmem:[#allocation7 + $0x178] sm:$0xff] }
 0x1a0   :  { %943 = vmatprep.subr.mxu1 %v212_v27  ;;  %1014 = vmatprep.subr.mxu0 %v214_v28  ;;  %v1335_v27 = vld [vmem:[#allocation7 + $0xe8] sm:$0xff]  ;;  %v1368_v28 = vld [vmem:[#allocation7 + $0x1f0] sm:$0xff] }
 0x1a1   :  { %944 = vmatpush1.msra.mxu1 %v211_v30  ;;  %977 = vmatprep.mubr.f32.mxu1 %v2474_v0  ;;  %v1319_v30 = vld [vmem:[#allocation7 + $0x68] sm:$0xff] }
 0x1a2   :  { %1015 = vmatpush1.msra.mxu0 %v213_v31  ;;  %1048 = vmatprep.mubr.f32.mxu0 %v2474_v0  ;;  %v1352_v31 = vld [vmem:[#allocation7 + $0x170] sm:$0xff] }
 0x1a3   :  { %978 = vmatmul.mubr.f32.vlgmr.msra.gmra.mxu1 %v2577_v26  ;;  %1049 = vmatmul.mubr.f32.vlgmr.msra.gmra.mxu0 %v2577_v26 }
 0x1a4   :  { %1055 = vmatprep.subr.mxu1 %v486_v32  ;;  %1119 = vmatprep.mubr.f32.mxu1 %v2474_v0  ;;  %v1334_v32 = vld [vmem:[#allocation7 + $0xe0] sm:$0xff] }
 0x1a5   :  { %1056 = vmatpush1.msra.mxu1 %v485_v33  ;;  %2248 = vmatprep.subr.mxu0 %v2474_v0  ;;  %v1367_v33 = vld [vmem:[#allocation7 + $0x1e8] sm:$0xff] }
 0x1a6   :  { %1057 = vmatprep.subr.mxu1 %v468_v34  ;;  %2249 = vmatpush3.msra.mxu0 %v2593_v35  ;;  %v1318_v34 = vld [vmem:[#allocation7 + $0x60] sm:$0xff] }
 0x1a7   :  { %1058 = vmatpush1.msra.mxu1 %v467_v36  ;;  %2250 = vmatprep.subr.mxu0 %v2474_v0  ;;  %v1366_v36 = vld [vmem:[#allocation7 + $0x1e0] sm:$0xff] }
 0x1a8   :  { %1059 = vmatprep.subr.mxu1 %v450_v37  ;;  %2251 = vmatpush3.msra.mxu0 %v2597_v29  ;;  %v1317_v37 = vld [vmem:[#allocation7 + $0x58] sm:$0xff] }
 0x1a9   :  { %1060 = vmatpush1.msra.mxu1 %v449_v38  ;;  %2252 = vmatprep.subr.mxu0 %v2474_v0  ;;  %v1332_v38 = vld [vmem:[#allocation7 + $0xd0] sm:$0xff] }
 0x1aa   :  { %1061 = vmatprep.subr.mxu1 %v432_v39  ;;  %2253 = vmatpush3.msra.mxu0 %v2601_v40  ;;  %v1365_v39 = vld [vmem:[#allocation7 + $0x1d8] sm:$0xff] }
 0x1ab   :  { %1062 = vmatpush1.msra.mxu1 %v431_v41  ;;  %2254 = vmatprep.subr.mxu0 %v2474_v0  ;;  %v1349_v41 = vld [vmem:[#allocation7 + $0x158] sm:$0xff] }
 0x1ac   :  { %1063 = vmatprep.subr.mxu1 %v414_v42  ;;  %2255 = vmatpush3.msra.mxu0 %v2605_v43  ;;  %v1331_v42 = vld [vmem:[#allocation7 + $0xc8] sm:$0xff] }
 0x1ad   :  { %1064 = vmatpush1.msra.mxu1 %v413_v44  ;;  %2256 = vmatprep.subr.mxu0 %v2474_v0  ;;  %v1315_v44 = vld [vmem:[#allocation7 + $0x48] sm:$0xff] }
 0x1ae   :  { %1065 = vmatprep.subr.mxu1 %v396_v45  ;;  %2257 = vmatpush3.msra.mxu0 %v2609_v46  ;;  %v1348_v45 = vld [vmem:[#allocation7 + $0x150] sm:$0xff] }
 0x1af   :  { %1066 = vmatpush1.msra.mxu1 %v395_v47  ;;  %2258 = vmatprep.subr.mxu0 %v2474_v0  ;;  %v1363_v47 = vld [vmem:[#allocation7 + $0x1c8] sm:$0xff] }
 0x1b0   :  { %1067 = vmatprep.subr.mxu1 %v378_v48  ;;  %2259 = vmatpush3.msra.mxu0 %v2613_v49  ;;  %v1314_v48 = vld [vmem:[#allocation7 + $0x40] sm:$0xff] }
 0x1b1   :  { %1068 = vmatpush1.msra.mxu1 %v377_v50  ;;  %2260 = vmatprep.subr.mxu0 %v2474_v0  ;;  %v1329_v50 = vld [vmem:[#allocation7 + $0xb8] sm:$0xff] }
 0x1b2   :  { %1069 = vmatprep.subr.mxu1 %v360_v51  ;;  %2261 = vmatpush3.msra.mxu0 %v2617_v52  ;;  %v1362_v51 = vld [vmem:[#allocation7 + $0x1c0] sm:$0xff] }
 0x1b3   :  { %1070 = vmatpush1.msra.mxu1 %v359_v53  ;;  %2262 = vmatprep.subr.mxu0 %v2474_v0  ;;  %v1346_v53 = vld [vmem:[#allocation7 + $0x140] sm:$0xff] }
 0x1b4   :  { %1071 = vmatprep.subr.mxu1 %v342_v54  ;;  %2263 = vmatpush3.msra.mxu0 %v2621_v55  ;;  %v1328_v54 = vld [vmem:[#allocation7 + $0xb0] sm:$0xff] }
 0x1b5   :  { %1072 = vmatpush1.msra.mxu1 %v341_v56  ;;  %2264 = vmatprep.subr.mxu0 %v2474_v0  ;;  %v1312_v56 = vld [vmem:[#allocation7 + $0x30] sm:$0xff] }
 0x1b6   :  { %1073 = vmatprep.subr.mxu1 %v324_v57  ;;  %2265 = vmatpush3.msra.mxu0 %v2625_v58  ;;  %v1345_v57 = vld [vmem:[#allocation7 + $0x138] sm:$0xff] }
 0x1b7   :  { %1074 = vmatpush1.msra.mxu1 %v323_v59  ;;  %2266 = vmatprep.subr.mxu0 %v2474_v0  ;;  %v1360_v59 = vld [vmem:[#allocation7 + $0x1b0] sm:$0xff] }
 0x1b8   :  { %1075 = vmatprep.subr.mxu1 %v306_v60  ;;  %2267 = vmatpush3.msra.mxu0 %v2629_v61  ;;  %v1311_v60 = vld [vmem:[#allocation7 + $0x28] sm:$0xff] }
 0x1b9   :  { %1076 = vmatpush1.msra.mxu1 %v305_v62  ;;  %2268 = vmatprep.subr.mxu0 %v2474_v0  ;;  %v1326_v62 = vld [vmem:[#allocation7 + $0xa0] sm:$0xff] }
 0x1ba   :  { %1077 = vmatprep.subr.mxu1 %v288_v63  ;;  %2269 = vmatpush3.msra.mxu0 %v2633_v1  ;;  %v1359_v63 = vld [vmem:[#allocation7 + $0x1a8] sm:$0xff] }
 0x1bb   :  { %1078 = vmatpush1.msra.mxu1 %v287_v2  ;;  %2270 = vmatprep.subr.mxu0 %v2474_v0  ;;  %v1343_v2 = vld [vmem:[#allocation7 + $0x128] sm:$0xff] }
 0x1bc   :  { %1079 = vmatprep.subr.mxu1 %v270_v3  ;;  %2271 = vmatpush3.msra.mxu0 %v1131_v4  ;;  %v1325_v3 = vld [vmem:[#allocation7 + $0x98] sm:$0xff] }
 0x1bd   :  { %1080 = vmatpush1.msra.mxu1 %v269_v5  ;;  %2272 = vmatprep.subr.mxu0 %v2474_v0  ;;  %v1309_v5 = vld [vmem:[#allocation7 + $0x18] sm:$0xff] }
 0x1be   :  { %1081 = vmatprep.subr.mxu1 %v252_v6  ;;  %2273 = vmatpush3.msra.mxu0 %v1130_v7  ;;  %v1342_v6 = vld [vmem:[#allocation7 + $0x120] sm:$0xff] }
 0x1bf   :  { %1082 = vmatpush1.msra.mxu1 %v251_v8  ;;  %2274 = vmatprep.subr.mxu0 %v2474_v0  ;;  %v1357_v8 = vld [vmem:[#allocation7 + $0x198] sm:$0xff] }
 0x1c0   :  { %1083 = vmatprep.subr.mxu1 %v234_v9  ;;  %2275 = vmatpush3.msra.mxu0 %v1129_v10 }
 0x1c1   :  { %1084 = vmatpush1.msra.mxu1 %v233_v11  ;;  %2276 = vmatprep.subr.mxu0 %v2474_v0  ;;  %v1341_v11 = vld [vmem:[#allocation7 + $0x118] sm:$0xff] }
 0x1c2   :  { %1085 = vmatprep.subr.mxu1 %v216_v12  ;;  %2277 = vmatpush3.msra.mxu0 %v1128_v13  ;;  %v1323_v12 = vld [vmem:[#allocation7 + $0x88] sm:$0xff] }
 0x1c3   :  { %1086 = vmatpush1.msra.mxu1 %v215_v14  ;;  %2278 = vmatprep.subr.mxu0 %v2474_v0  ;;  %v1307_v14 = vld [vmem:[#allocation7 + $0x8] sm:$0xff] }
 0x1c4   :  { %1120 = vmatmul.mubr.f32.vlgmr.msra.gmra.mxu1 %v2577_v26  ;;  %2283 = vmatprep.subr.mxu1 %v2474_v0 }
 0x1c5   :  { %2284 = vmatpush3.msra.mxu1 %v2593_v35  ;;  %2279 = vmatpush3.msra.mxu0 %v1127_v15  ;;  %v1351_v35 = vld [vmem:[#allocation7 + $0x168] sm:$0xff] }
 0x1c6   :  { %2285 = vmatprep.subr.mxu1 %v2474_v0  ;;  %2280 = vmatprep.mubr.msk.f32.mxu0 %vm2475_vm0, %v2474_v0 }
 0x1c7   :  { %2286 = vmatpush3.msra.mxu1 %v2597_v29  ;;  %2315 = vmatprep.mubr.msk.f32.mxu1 %vm2475_vm0, %v2474_v0  ;;  %v1350_v29 = vld [vmem:[#allocation7 + $0x160] sm:$0xff] }
 0x1c8   :  { %2287 = vmatprep.subr.mxu1 %v2474_v0  ;;  %2003 = vmatprep.subr.mxu0 %v1337_v16  ;;  %v1322_v16 = vld [vmem:[#allocation7 + $0x80] sm:$0xff] }
 0x1c9   :  { %2288 = vmatpush3.msra.mxu1 %v2601_v40  ;;  %v1316_v40 = vld [vmem:[#allocation7 + $0x50] sm:$0xff] }
 0x1ca   :  { %2289 = vmatprep.subr.mxu1 %v2474_v0 }
 0x1cb   :  { %2290 = vmatpush3.msra.mxu1 %v2605_v43  ;;  %v1364_v43 = vld [vmem:[#allocation7 + $0x1d0] sm:$0xff] }
 0x1cc   :  { %2291 = vmatprep.subr.mxu1 %v2474_v0 }
 0x1cd   :  { %2292 = vmatpush3.msra.mxu1 %v2609_v46  ;;  %v1330_v46 = vld [vmem:[#allocation7 + $0xc0] sm:$0xff] }
 0x1ce   :  { %2293 = vmatprep.subr.mxu1 %v2474_v0 }
 0x1cf   :  { %2294 = vmatpush3.msra.mxu1 %v2613_v49  ;;  %v1347_v49 = vld [vmem:[#allocation7 + $0x148] sm:$0xff] }
 0x1d0   :  { %2295 = vmatprep.subr.mxu1 %v2474_v0 }
 0x1d1   :  { %2296 = vmatpush3.msra.mxu1 %v2617_v52  ;;  %v1313_v52 = vld [vmem:[#allocation7 + $0x38] sm:$0xff] }
 0x1d2   :  { %2297 = vmatprep.subr.mxu1 %v2474_v0 }
 0x1d3   :  { %2298 = vmatpush3.msra.mxu1 %v2621_v55  ;;  %v1361_v55 = vld [vmem:[#allocation7 + $0x1b8] sm:$0xff] }
 0x1d4   :  { %2299 = vmatprep.subr.mxu1 %v2474_v0 }
 0x1d5   :  { %2300 = vmatpush3.msra.mxu1 %v2625_v58  ;;  %v1327_v58 = vld [vmem:[#allocation7 + $0xa8] sm:$0xff] }
 0x1d6   :  { %2301 = vmatprep.subr.mxu1 %v2474_v0 }
 0x1d7   :  { %2302 = vmatpush3.msra.mxu1 %v2629_v61  ;;  %v1344_v61 = vld [vmem:[#allocation7 + $0x130] sm:$0xff] }
 0x1d8   :  { %2303 = vmatprep.subr.mxu1 %v2474_v0 }
 0x1d9   :  { %2304 = vmatpush3.msra.mxu1 %v2633_v1  ;;  %v1310_v1 = vld [vmem:[#allocation7 + $0x20] sm:$0xff] }
 0x1da   :  { %2305 = vmatprep.subr.mxu1 %v2474_v0 }
 0x1db   :  { %2306 = vmatpush3.msra.mxu1 %v1131_v4  ;;  %v1358_v4 = vld [vmem:[#allocation7 + $0x1a0] sm:$0xff] }
 0x1dc   :  { %2307 = vmatprep.subr.mxu1 %v2474_v0 }
 0x1dd   :  { %2308 = vmatpush3.msra.mxu1 %v1130_v7  ;;  %v1324_v7 = vld [vmem:[#allocation7 + $0x90] sm:$0xff] }
 0x1de   :  { %2309 = vmatprep.subr.mxu1 %v2474_v0 }
 0x1df   :  { %2310 = vmatpush3.msra.mxu1 %v1129_v10  ;;  %v1308_v10 = vld [vmem:[#allocation7 + $0x10] sm:$0xff] }
 0x1e0   :  { %2311 = vmatprep.subr.mxu1 %v2474_v0 }
 0x1e1   :  { %2312 = vmatpush3.msra.mxu1 %v1128_v13  ;;  %v1356_v13 = vld [vmem:[#allocation7 + $0x190] sm:$0xff] }
 0x1e2   :  { %2313 = vmatprep.subr.mxu1 %v2474_v0 }
 0x1e3   :  { %2314 = vmatpush3.msra.mxu1 %v1127_v15  ;;  %v1340_v15 = vld [vmem:[#allocation7 + $0x110] sm:$0xff] }
 0x1e4   :  { %2038 = vmatprep.subr.mxu1 %v1369_v17  ;;  %v1355_v17 = vld [vmem:[#allocation7 + $0x188] sm:$0xff] }
 0x1fe   :  { %v553_v18 = vpop.f32.mrf.mxu1  ;;  %v624_v9 = vpop.f32.mrf.mxu0 }
 0x1ff   :  { %v1126_v19 = vmul.f32 %v553_v18, %v2577_v26 }
 0x200   :  { %v555_v21 = vpop.f32.mrf.mxu1  ;;  %v626_v18 = vpop.f32.mrf.mxu0 }
 0x201   :  { %v1213_v23 = vmul.f32 %v555_v21, %v2577_v26  ;;  %2281 = vmatmul.mubr.f32.vlgmr.msra.gmra.mxu0 %v1126_v19  ;;  %v1333_v26 = vld [vmem:[#allocation7 + $0xd8] sm:$0xff]  ;;  %v1306_v19 = vld [vmem:[#allocation7] sm:$0xff] }
 0x202   :  { %2004 = vmatpush3.msra.mxu0 %v1321_v20  ;;  %v1339_v20 = vld [vmem:[#allocation7 + $0x108] sm:$0xff]  ;;  %v1541_v21 = vld [vmem:[#allocation9 + $0xf8] sm:$0xff] }
 0x203   :  { %2316 = vmatmul.mubr.f32.vlgmr.msra.gmra.mxu1 %v1213_v23  ;;  %2005 = vmatprep.subr.mxu0 %v1336_v22  ;;  %v1354_v22 = vld [vmem:[#allocation7 + $0x180] sm:$0xff] }
 0x204   :  { %2006 = vmatpush3.msra.mxu0 %v1320_v24  ;;  %2039 = vmatpush3.msra.mxu1 %v1353_v25  ;;  %v1338_v24 = vld [vmem:[#allocation7 + $0x100] sm:$0xff]  ;;  %v1573_v25 = vld [vmem:[#allocation9 + $0x1f8] sm:$0xff] }
 0x205   :  { %2007 = vmatprep.subr.mxu0 %v1335_v27  ;;  %2040 = vmatprep.subr.mxu1 %v1368_v28 }
 0x206   :  { %2008 = vmatpush3.msra.mxu0 %v1319_v30  ;;  %2041 = vmatpush3.msra.mxu1 %v1352_v31  ;;  %v1295_v30 = vmul.f32 %v626_v18, %v626_v18  ;;  %v1765_v18 = vld [vmem:[#allocation10 + $0xe8] sm:$0xff] }
 0x207   :  { %2009 = vmatprep.subr.mxu0 %v1334_v32  ;;  %2042 = vmatprep.subr.mxu1 %v1367_v33  ;;  %v1294_v32 = vmul.f32 %v624_v9, %v624_v9 }
 0x208   :  { %2010 = vmatpush3.msra.mxu0 %v1318_v34  ;;  %2043 = vmatpush3.msra.mxu1 %v1351_v35  ;;  %v1525_v35 = vld [vmem:[#allocation9 + $0x78] sm:$0xff] }
 0x209   :  { %2011 = vmatprep.subr.mxu0 %v1333_v26  ;;  %2044 = vmatprep.subr.mxu1 %v1366_v36  ;;  %v1540_v26 = vld [vmem:[#allocation9 + $0xf0] sm:$0xff] }
 0x20a   :  { %2012 = vmatpush3.msra.mxu0 %v1317_v37  ;;  %2045 = vmatpush3.msra.mxu1 %v1350_v29  ;;  %v1524_v36 = vld [vmem:[#allocation9 + $0x70] sm:$0xff]  ;;  %v1539_v37 = vld [vmem:[#allocation9 + $0xe8] sm:$0xff] }
 0x20b   :  { %2013 = vmatprep.subr.mxu0 %v1332_v38  ;;  %2046 = vmatprep.subr.mxu1 %v1365_v39  ;;  %v1523_v29 = vld [vmem:[#allocation9 + $0x68] sm:$0xff]  ;;  %v1538_v38 = vld [vmem:[#allocation9 + $0xe0] sm:$0xff] }
 0x20c   :  { %2014 = vmatpush3.msra.mxu0 %v1316_v40  ;;  %2047 = vmatpush3.msra.mxu1 %v1349_v41  ;;  %v1522_v39 = vld [vmem:[#allocation9 + $0x60] sm:$0xff]  ;;  %v1537_v40 = vld [vmem:[#allocation9 + $0xd8] sm:$0xff] }
 0x20d   :  { %2015 = vmatprep.subr.mxu0 %v1331_v42  ;;  %2048 = vmatprep.subr.mxu1 %v1364_v43  ;;  %v1521_v41 = vld [vmem:[#allocation9 + $0x58] sm:$0xff]  ;;  %v1536_v42 = vld [vmem:[#allocation9 + $0xd0] sm:$0xff] }
 0x20e   :  { %2016 = vmatpush3.msra.mxu0 %v1315_v44  ;;  %2049 = vmatpush3.msra.mxu1 %v1348_v45  ;;  %v1520_v43 = vld [vmem:[#allocation9 + $0x50] sm:$0xff]  ;;  %v1535_v44 = vld [vmem:[#allocation9 + $0xc8] sm:$0xff] }
 0x20f   :  { %2017 = vmatprep.subr.mxu0 %v1330_v46  ;;  %2050 = vmatprep.subr.mxu1 %v1363_v47  ;;  %v1519_v45 = vld [vmem:[#allocation9 + $0x48] sm:$0xff]  ;;  %v1534_v46 = vld [vmem:[#allocation9 + $0xc0] sm:$0xff] }
 0x210   :  { %2018 = vmatpush3.msra.mxu0 %v1314_v48  ;;  %2051 = vmatpush3.msra.mxu1 %v1347_v49  ;;  %v1518_v47 = vld [vmem:[#allocation9 + $0x40] sm:$0xff]  ;;  %v1533_v48 = vld [vmem:[#allocation9 + $0xb8] sm:$0xff] }
 0x211   :  { %2019 = vmatprep.subr.mxu0 %v1329_v50  ;;  %2052 = vmatprep.subr.mxu1 %v1362_v51  ;;  %v1517_v49 = vld [vmem:[#allocation9 + $0x38] sm:$0xff]  ;;  %v1532_v50 = vld [vmem:[#allocation9 + $0xb0] sm:$0xff] }
 0x212   :  { %2020 = vmatpush3.msra.mxu0 %v1313_v52  ;;  %2053 = vmatpush3.msra.mxu1 %v1346_v53  ;;  %v1516_v51 = vld [vmem:[#allocation9 + $0x30] sm:$0xff]  ;;  %v1531_v52 = vld [vmem:[#allocation9 + $0xa8] sm:$0xff] }
 0x213   :  { %2021 = vmatprep.subr.mxu0 %v1328_v54  ;;  %2054 = vmatprep.subr.mxu1 %v1361_v55  ;;  %v1515_v53 = vld [vmem:[#allocation9 + $0x28] sm:$0xff]  ;;  %v1530_v54 = vld [vmem:[#allocation9 + $0xa0] sm:$0xff] }
 0x214   :  { %2022 = vmatpush3.msra.mxu0 %v1312_v56  ;;  %2055 = vmatpush3.msra.mxu1 %v1345_v57  ;;  %v1514_v56 = vld [vmem:[#allocation9 + $0x20] sm:$0xff]  ;;  %v1529_v57 = vld [vmem:[#allocation9 + $0x98] sm:$0xff] }
 0x215   :  { %2023 = vmatprep.subr.mxu0 %v1327_v58  ;;  %2056 = vmatprep.subr.mxu1 %v1360_v59  ;;  %v1513_v58 = vld [vmem:[#allocation9 + $0x18] sm:$0xff]  ;;  %v1528_v59 = vld [vmem:[#allocation9 + $0x90] sm:$0xff] }
 0x216   :  { %2024 = vmatpush3.msra.mxu0 %v1311_v60  ;;  %2057 = vmatpush3.msra.mxu1 %v1344_v61  ;;  %v1512_v61 = vld [vmem:[#allocation9 + $0x10] sm:$0xff] }
 0x217   :  { %2025 = vmatprep.subr.mxu0 %v1326_v62  ;;  %2058 = vmatprep.subr.mxu1 %v1359_v63  ;;  %v1527_v62 = vld [vmem:[#allocation9 + $0x88] sm:$0xff] }
 0x218   :  { %2026 = vmatpush3.msra.mxu0 %v1310_v1  ;;  %2059 = vmatpush3.msra.mxu1 %v1343_v2  ;;  %v1511_v1 = vld [vmem:[#allocation9 + $0x8] sm:$0xff]  ;;  %v1526_v2 = vld [vmem:[#allocation9 + $0x80] sm:$0xff] }
 0x219   :  { %2027 = vmatprep.subr.mxu0 %v1325_v3  ;;  %2060 = vmatprep.subr.mxu1 %v1358_v4 }
 0x21a   :  { %2028 = vmatpush3.msra.mxu0 %v1309_v5  ;;  %2061 = vmatpush3.msra.mxu1 %v1342_v6  ;;  %v1510_v5 = vld [vmem:[#allocation9] sm:$0xff] }
 0x21b   :  { %2029 = vmatprep.subr.mxu0 %v1324_v7  ;;  %2062 = vmatprep.subr.mxu1 %v1357_v8  ;;  %v1767_v8 = vld [vmem:[#allocation10 + $0xf8] sm:$0xff] }
 0x21c   :  { %2030 = vmatpush3.msra.mxu0 %v1308_v10  ;;  %2063 = vmatpush3.msra.mxu1 %v1341_v11  ;;  %v1751_v10 = vld [vmem:[#allocation10 + $0x78] sm:$0xff] }
 0x21d   :  { %2031 = vmatprep.subr.mxu0 %v1323_v12  ;;  %2064 = vmatprep.subr.mxu1 %v1356_v13  ;;  %v1766_v12 = vld [vmem:[#allocation10 + $0xf0] sm:$0xff] }
 0x21e   :  { %2032 = vmatpush3.msra.mxu0 %v1307_v14  ;;  %2065 = vmatpush3.msra.mxu1 %v1340_v15  ;;  %v1557_v14 = vld [vmem:[#allocation9 + $0x178] sm:$0xff]  ;;  %v1572_v15 = vld [vmem:[#allocation9 + $0x1f0] sm:$0xff] }
 0x21f   :  { %v766_v23 = vpop.f32.mrf.mxu0  ;;  %2033 = vmatprep.subr.mxu0 %v1322_v16  ;;  %2066 = vmatprep.subr.mxu1 %v1355_v17  ;;  %v695_v55 = vpop.f32.mrf.mxu1  ;;  %v1750_v16 = vld [vmem:[#allocation10 + $0x70] sm:$0xff] }
 0x220   :  { %2034 = vmatpush3.msra.mxu0 %v1306_v19  ;;  %2067 = vmatpush3.msra.mxu1 %v1339_v20  ;;  %v1298_v27 = vmul.f32 %v766_v23, %v766_v23  ;;  %v1296_v9 = vmul.f32 %v695_v55, %v695_v55  ;;  %v1556_v17 = vld [vmem:[#allocation9 + $0x170] sm:$0xff]  ;;  %v1571_v19 = vld [vmem:[#allocation9 + $0x1e8] sm:$0xff]  ;;  %v1570_v23 = vld [vmem:[#allocation9 + $0x1e0] sm:$0xff] }
 0x221   :  { %v768_v28 = vpop.f32.mrf.mxu0  ;;  %2073 = vmatprep.subr.mxu0 %v1541_v21  ;;  %2068 = vmatprep.subr.mxu1 %v1354_v22  ;;  %v697_v60 = vpop.f32.mrf.mxu1  ;;  %v1749_v20 = vld [vmem:[#allocation10 + $0x68] sm:$0xff]  ;;  %v1764_v22 = vld [vmem:[#allocation10 + $0xe0] sm:$0xff] }
 0x222   :  { %v1299_v31 = vmul.f32 %v768_v28, %v768_v28  ;;  %2069 = vmatpush3.msra.mxu1 %v1338_v24  ;;  %v2677_v34 = vadd.f32 %v1298_v27, %v1294_v32  ;;  %v1297_v6 = vmul.f32 %v697_v60, %v697_v60  ;;  %v1555_v21 = vld [vmem:[#allocation9 + $0x168] sm:$0xff]  ;;  %v1748_v24 = vld [vmem:[#allocation10 + $0x60] sm:$0xff]  ;;  %v1763_v27 = vld [vmem:[#allocation10 + $0xd8] sm:$0xff] }
 0x223   :  { %2108 = vmatprep.subr.mxu1 %v1573_v25  ;;  %v1554_v25 = vld [vmem:[#allocation9 + $0x160] sm:$0xff]  ;;  %v1569_v28 = vld [vmem:[#allocation9 + $0x1d8] sm:$0xff]  ;;  %v1762_v32 = vld [vmem:[#allocation10 + $0xd0] sm:$0xff] }
 0x224   :  { %v1303_v33 = vadd.f32 %v1299_v31, %v1295_v30  ;;  %v1747_v30 = vld [vmem:[#allocation10 + $0x58] sm:$0xff]  ;;  %v1562_v55 = vld [vmem:[#allocation9 + $0x1a0] sm:$0xff] }
 0x225   :  { %v1553_v31 = vld [vmem:[#allocation9 + $0x158] sm:$0xff] }
 0x226   :  { %1434 = vmatprep.mubr.f32.mxu0 %v1303_v33  ;;  %v1561_v60 = vld [vmem:[#allocation9 + $0x198] sm:$0xff] }
 0x227   :  { %1435 = vmatmul.mubr.f32.vlgmr.msra.gmra.mxu0 %v2677_v34 }
 0x228   :  { %2074 = vmatpush3.msra.mxu0 %v1525_v35  ;;  %1646 = vmatprep.mubr.f32.mxu0 %v1303_v33  ;;  %v1568_v33 = vld [vmem:[#allocation9 + $0x1d0] sm:$0xff] }
 0x229   :  { %2075 = vmatprep.subr.mxu0 %v1540_v26  ;;  %v1552_v35 = vld [vmem:[#allocation9 + $0x150] sm:$0xff]  ;;  %v1761_v26 = vld [vmem:[#allocation10 + $0xc8] sm:$0xff] }
 0x22a   :  { %2076 = vmatpush3.msra.mxu0 %v1524_v36  ;;  %v1567_v36 = vld [vmem:[#allocation9 + $0x1c8] sm:$0xff] }
 0x22b   :  { %2077 = vmatprep.subr.mxu0 %v1539_v37  ;;  %v1745_v37 = vld [vmem:[#allocation10 + $0x48] sm:$0xff] }
 0x22c   :  { %2078 = vmatpush3.msra.mxu0 %v1523_v29  ;;  %v1551_v29 = vld [vmem:[#allocation9 + $0x148] sm:$0xff] }
 0x22d   :  { %2079 = vmatprep.subr.mxu0 %v1538_v38  ;;  %v1760_v38 = vld [vmem:[#allocation10 + $0xc0] sm:$0xff] }
 0x22e   :  { %2080 = vmatpush3.msra.mxu0 %v1522_v39  ;;  %v1566_v39 = vld [vmem:[#allocation9 + $0x1c0] sm:$0xff] }
 0x22f   :  { %2081 = vmatprep.subr.mxu0 %v1537_v40  ;;  %v1744_v40 = vld [vmem:[#allocation10 + $0x40] sm:$0xff] }
 0x230   :  { %2082 = vmatpush3.msra.mxu0 %v1521_v41  ;;  %v1550_v41 = vld [vmem:[#allocation9 + $0x140] sm:$0xff] }
 0x231   :  { %2083 = vmatprep.subr.mxu0 %v1536_v42  ;;  %v1759_v42 = vld [vmem:[#allocation10 + $0xb8] sm:$0xff] }
 0x232   :  { %2084 = vmatpush3.msra.mxu0 %v1520_v43  ;;  %v1565_v43 = vld [vmem:[#allocation9 + $0x1b8] sm:$0xff] }
 0x233   :  { %2085 = vmatprep.subr.mxu0 %v1535_v44  ;;  %v1743_v44 = vld [vmem:[#allocation10 + $0x38] sm:$0xff] }
 0x234   :  { %2086 = vmatpush3.msra.mxu0 %v1519_v45  ;;  %v1549_v45 = vld [vmem:[#allocation9 + $0x138] sm:$0xff] }
 0x235   :  { %2087 = vmatprep.subr.mxu0 %v1534_v46  ;;  %v1758_v46 = vld [vmem:[#allocation10 + $0xb0] sm:$0xff] }
 0x236   :  { %2088 = vmatpush3.msra.mxu0 %v1518_v47  ;;  %v1564_v47 = vld [vmem:[#allocation9 + $0x1b0] sm:$0xff] }
 0x237   :  { %2089 = vmatprep.subr.mxu0 %v1533_v48  ;;  %v1742_v48 = vld [vmem:[#allocation10 + $0x30] sm:$0xff] }
 0x238   :  { %2090 = vmatpush3.msra.mxu0 %v1517_v49  ;;  %v1548_v49 = vld [vmem:[#allocation9 + $0x130] sm:$0xff] }
 0x239   :  { %2091 = vmatprep.subr.mxu0 %v1532_v50  ;;  %v1757_v50 = vld [vmem:[#allocation10 + $0xa8] sm:$0xff] }
 0x23a   :  { %2092 = vmatpush3.msra.mxu0 %v1516_v51  ;;  %v1563_v51 = vld [vmem:[#allocation9 + $0x1a8] sm:$0xff] }
 0x23b   :  { %2093 = vmatprep.subr.mxu0 %v1531_v52  ;;  %v1741_v52 = vld [vmem:[#allocation10 + $0x28] sm:$0xff] }
 0x23c   :  { %2094 = vmatpush3.msra.mxu0 %v1515_v53  ;;  %v1547_v53 = vld [vmem:[#allocation9 + $0x128] sm:$0xff] }
 0x23d   :  { %2095 = vmatprep.subr.mxu0 %v1530_v54  ;;  %v1756_v54 = vld [vmem:[#allocation10 + $0xa0] sm:$0xff] }
 0x23e   :  { %2096 = vmatpush3.msra.mxu0 %v1514_v56  ;;  %v1740_v56 = vld [vmem:[#allocation10 + $0x20] sm:$0xff] }
 0x23f   :  { %2097 = vmatprep.subr.mxu0 %v1529_v57 }
 0x240   :  { %2098 = vmatpush3.msra.mxu0 %v1513_v58  ;;  %v1546_v58 = vld [vmem:[#allocation9 + $0x120] sm:$0xff] }
 0x241   :  { %v837_v63 = vpop.f32.mrf.mxu1  ;;  %2099 = vmatprep.subr.mxu0 %v1528_v59  ;;  %v908_v57 = vpop.f32.mrf.mxu0  ;;  %v1755_v59 = vld [vmem:[#allocation10 + $0x98] sm:$0xff] }
 0x242   :  { %2100 = vmatpush3.msra.mxu0 %v1512_v61  ;;  %v1300_v3 = vmul.f32 %v837_v63, %v837_v63  ;;  %v1739_v61 = vld [vmem:[#allocation10 + $0x18] sm:$0xff]  ;;  %v1754_v63 = vld [vmem:[#allocation10 + $0x90] sm:$0xff] }
 0x243   :  { %v839_v4 = vpop.f32.mrf.mxu1  ;;  %2101 = vmatprep.subr.mxu0 %v1527_v62  ;;  %v1545_v62 = vld [vmem:[#allocation9 + $0x118] sm:$0xff] }
 0x244   :  { %v1301_v7 = vmul.f32 %v839_v4, %v839_v4  ;;  %2102 = vmatpush3.msra.mxu0 %v1511_v1  ;;  %v2680_v13 = vadd.f32 %v1300_v3, %v1296_v9  ;;  %v1560_v1 = vld [vmem:[#allocation9 + $0x190] sm:$0xff]  ;;  %v910_v3 = vpop.f32.mrf.mxu0  ;;  %v1543_v9 = vld [vmem:[#allocation9 + $0x108] sm:$0xff] }
 0x245   :  { %2103 = vmatprep.subr.mxu0 %v1526_v2  ;;  %v1738_v2 = vld [vmem:[#allocation10 + $0x10] sm:$0xff] }
 0x246   :  { %v1305_v11 = vadd.f32 %v1301_v7, %v1297_v6  ;;  %2104 = vmatpush3.msra.mxu0 %v1510_v5  ;;  %v1544_v4 = vld [vmem:[#allocation9 + $0x110] sm:$0xff]  ;;  %v1753_v5 = vld [vmem:[#allocation10 + $0x88] sm:$0xff] }
 0x247   :  { %1647 = vmatmul.mubr.f32.vlgmr.msra.gmra.mxu0 %v2677_v34  ;;  %2143 = vmatprep.subr.mxu0 %v1767_v8  ;;  %v1746_v34 = vld [vmem:[#allocation10 + $0x50] sm:$0xff]  ;;  %v1559_v6 = vld [vmem:[#allocation9 + $0x188] sm:$0xff] }
 0x248   :  { %1504 = vmatprep.mubr.f32.mxu1 %v1305_v11  ;;  %2144 = vmatpush3.msra.mxu0 %v1751_v10  ;;  %v1737_v7 = vld [vmem:[#allocation10 + $0x8] sm:$0xff]  ;;  %v1752_v10 = vld [vmem:[#allocation10 + $0x80] sm:$0xff] }
 0x249   :  { %1505 = vmatmul.mubr.f32.vlgmr.msra.gmra.mxu1 %v2680_v13  ;;  %2145 = vmatprep.subr.mxu0 %v1766_v12  ;;  %v1736_v12 = vld [vmem:[#allocation10] sm:$0xff] }
 0x24a   :  { %2109 = vmatpush3.msra.mxu1 %v1557_v14  ;;  %1716 = vmatprep.mubr.f32.mxu1 %v1305_v11  ;;  %v1558_v11 = vld [vmem:[#allocation9 + $0x180] sm:$0xff] }
 0x24b   :  { %2110 = vmatprep.subr.mxu1 %v1572_v15  ;;  %2146 = vmatpush3.msra.mxu0 %v1750_v16  ;;  %v1542_v16 = vld [vmem:[#allocation9 + $0x100] sm:$0xff] }
 0x24c   :  { %2111 = vmatpush3.msra.mxu1 %v1556_v17  ;;  %2147 = vmatprep.subr.mxu0 %v1765_v18  ;;  %v1725_v17 = vmul.f32 %v910_v3, %v910_v3 }
 0x24d   :  { %2112 = vmatprep.subr.mxu1 %v1571_v19  ;;  %2148 = vmatpush3.msra.mxu0 %v1749_v20  ;;  %v1799_v19 = vld [vmem:[#allocation10 + $0x1f8] sm:$0xff]  ;;  %v1724_v20 = vmul.f32 %v908_v57, %v908_v57 }
 0x24e   :  { %2113 = vmatpush3.msra.mxu1 %v1555_v21  ;;  %2149 = vmatprep.subr.mxu0 %v1764_v22  ;;  %v1783_v21 = vld [vmem:[#allocation10 + $0x178] sm:$0xff] }
 0x24f   :  { %2114 = vmatprep.subr.mxu1 %v1570_v23  ;;  %2150 = vmatpush3.msra.mxu0 %v1748_v24  ;;  %v1798_v23 = vld [vmem:[#allocation10 + $0x1f0] sm:$0xff] }
 0x250   :  { %2115 = vmatpush3.msra.mxu1 %v1554_v25  ;;  %2151 = vmatprep.subr.mxu0 %v1763_v27  ;;  %v1782_v25 = vld [vmem:[#allocation10 + $0x170] sm:$0xff]  ;;  %v1797_v27 = vld [vmem:[#allocation10 + $0x1e8] sm:$0xff] }
 0x251   :  { %2116 = vmatprep.subr.mxu1 %v1569_v28  ;;  %2152 = vmatpush3.msra.mxu0 %v1747_v30  ;;  %v1781_v28 = vld [vmem:[#allocation10 + $0x168] sm:$0xff]  ;;  %v1796_v30 = vld [vmem:[#allocation10 + $0x1e0] sm:$0xff] }
 0x252   :  { %2117 = vmatpush3.msra.mxu1 %v1553_v31  ;;  %2153 = vmatprep.subr.mxu0 %v1762_v32  ;;  %v1780_v31 = vld [vmem:[#allocation10 + $0x160] sm:$0xff]  ;;  %v1795_v32 = vld [vmem:[#allocation10 + $0x1d8] sm:$0xff] }
 0x253   :  { %2118 = vmatprep.subr.mxu1 %v1568_v33  ;;  %2154 = vmatpush3.msra.mxu0 %v1746_v34  ;;  %v1779_v33 = vld [vmem:[#allocation10 + $0x158] sm:$0xff]  ;;  %v1794_v34 = vld [vmem:[#allocation10 + $0x1d0] sm:$0xff] }
 0x254   :  { %2119 = vmatpush3.msra.mxu1 %v1552_v35  ;;  %2155 = vmatprep.subr.mxu0 %v1761_v26  ;;  %v1793_v35 = vld [vmem:[#allocation10 + $0x1c8] sm:$0xff] }
 0x255   :  { %2120 = vmatprep.subr.mxu1 %v1567_v36  ;;  %2156 = vmatpush3.msra.mxu0 %v1745_v37  ;;  %v1777_v26 = vld [vmem:[#allocation10 + $0x148] sm:$0xff]  ;;  %v1792_v36 = vld [vmem:[#allocation10 + $0x1c0] sm:$0xff] }
 0x256   :  { %2121 = vmatpush3.msra.mxu1 %v1551_v29  ;;  %2157 = vmatprep.subr.mxu0 %v1760_v38  ;;  %v1776_v37 = vld [vmem:[#allocation10 + $0x140] sm:$0xff]  ;;  %v1791_v29 = vld [vmem:[#allocation10 + $0x1b8] sm:$0xff] }
 0x257   :  { %2122 = vmatprep.subr.mxu1 %v1566_v39  ;;  %2158 = vmatpush3.msra.mxu0 %v1744_v40  ;;  %v1775_v38 = vld [vmem:[#allocation10 + $0x138] sm:$0xff]  ;;  %v1790_v39 = vld [vmem:[#allocation10 + $0x1b0] sm:$0xff] }
 0x258   :  { %2123 = vmatpush3.msra.mxu1 %v1550_v41  ;;  %2159 = vmatprep.subr.mxu0 %v1759_v42  ;;  %v1774_v40 = vld [vmem:[#allocation10 + $0x130] sm:$0xff]  ;;  %v1789_v41 = vld [vmem:[#allocation10 + $0x1a8] sm:$0xff] }
 0x259   :  { %2124 = vmatprep.subr.mxu1 %v1565_v43  ;;  %2160 = vmatpush3.msra.mxu0 %v1743_v44  ;;  %v1773_v42 = vld [vmem:[#allocation10 + $0x128] sm:$0xff]  ;;  %v1788_v43 = vld [vmem:[#allocation10 + $0x1a0] sm:$0xff] }
 0x25a   :  { %2125 = vmatpush3.msra.mxu1 %v1549_v45  ;;  %2161 = vmatprep.subr.mxu0 %v1758_v46  ;;  %v1772_v44 = vld [vmem:[#allocation10 + $0x120] sm:$0xff]  ;;  %v1787_v46 = vld [vmem:[#allocation10 + $0x198] sm:$0xff] }
 0x25b   :  { %2126 = vmatprep.subr.mxu1 %v1564_v47  ;;  %2162 = vmatpush3.msra.mxu0 %v1742_v48  ;;  %v1771_v47 = vld [vmem:[#allocation10 + $0x118] sm:$0xff]  ;;  %v1786_v48 = vld [vmem:[#allocation10 + $0x190] sm:$0xff] }
 0x25c   :  { %2127 = vmatpush3.msra.mxu1 %v1548_v49  ;;  %2163 = vmatprep.subr.mxu0 %v1757_v50  ;;  %v1770_v49 = vld [vmem:[#allocation10 + $0x110] sm:$0xff] }
 0x25d   :  { %2128 = vmatprep.subr.mxu1 %v1563_v51  ;;  %2164 = vmatpush3.msra.mxu0 %v1741_v52  ;;  %v1785_v51 = vld [vmem:[#allocation10 + $0x188] sm:$0xff] }
 0x25e   :  { %2129 = vmatpush3.msra.mxu1 %v1547_v53  ;;  %2165 = vmatprep.subr.mxu0 %v1756_v54  ;;  %v1769_v52 = vld [vmem:[#allocation10 + $0x108] sm:$0xff]  ;;  %v1784_v54 = vld [vmem:[#allocation10 + $0x180] sm:$0xff] }
 0x25f   :  { %2130 = vmatprep.subr.mxu1 %v1562_v55  ;;  %2166 = vmatpush3.msra.mxu0 %v1740_v56  ;;  %v1768_v55 = vld [vmem:[#allocation10 + $0x100] sm:$0xff] }
 0x260   :  { %2131 = vmatpush3.msra.mxu1 %v1546_v58  ;;  %2167 = vmatprep.subr.mxu0 %v1755_v59 }
 0x261   :  { %2132 = vmatprep.subr.mxu1 %v1561_v60  ;;  %2168 = vmatpush3.msra.mxu0 %v1739_v61 }
 0x262   :  { %2133 = vmatpush3.msra.mxu1 %v1545_v62  ;;  %2169 = vmatprep.subr.mxu0 %v1754_v63 }
 0x263   :  { %v1050_v8 = vpop.f32.mrf.mxu0  ;;  %2134 = vmatprep.subr.mxu1 %v1560_v1  ;;  %2170 = vmatpush3.msra.mxu0 %v1738_v2  ;;  %v979_v45 = vpop.f32.mrf.mxu1 }
 0x264   :  { %2135 = vmatpush3.msra.mxu1 %v1544_v4  ;;  %2171 = vmatprep.subr.mxu0 %v1753_v5  ;;  %v1728_v14 = vmul.f32 %v1050_v8, %v1050_v8  ;;  %v1726_v60 = vmul.f32 %v979_v45, %v979_v45 }
 0x265   :  { %v1052_v15 = vpop.f32.mrf.mxu0  ;;  %2136 = vmatprep.subr.mxu1 %v1559_v6  ;;  %2172 = vmatpush3.msra.mxu0 %v1737_v7  ;;  %v981_v50 = vpop.f32.mrf.mxu1  ;;  %v1574_v7 = vlaneseq }
 0x266   :  { %v1729_v18 = vmul.f32 %v1052_v15, %v1052_v15  ;;  %2137 = vmatpush3.msra.mxu1 %v1543_v9  ;;  %2173 = vmatprep.subr.mxu0 %v1752_v10  ;;  %v1732_v24 = vadd.f32 %v1728_v14, %v1724_v20  ;;  %v1727_v58 = vmul.f32 %v981_v50, %v981_v50 }
 0x267   :  { %2138 = vmatprep.subr.mxu1 %v1558_v11  ;;  %2174 = vmatpush3.msra.mxu0 %v1736_v12  ;;  %v1575_v9 = vand.u32 127, %v1574_v7 }
 0x268   :  { %v1733_v22 = vadd.f32 %v1729_v18, %v1725_v17  ;;  %2139 = vmatpush3.msra.mxu1 %v1542_v16 }
 0x269   :  { %1717 = vmatmul.mubr.f32.vlgmr.msra.gmra.mxu1 %v2680_v13  ;;  %2178 = vmatprep.subr.mxu1 %v1799_v19  ;;  %v1778_v13 = vld [vmem:[#allocation10 + $0x150] sm:$0xff]  ;;  %v1576_v12 = vand.u32 7, %v1575_v9 }
 0x26a   :  { %1864 = vmatprep.mubr.f32.mxu0 %v1733_v22  ;;  %2179 = vmatpush3.msra.mxu1 %v1783_v21 }
 0x26b   :  { %1865 = vmatmul.mubr.f32.vlgmr.msra.gmra.mxu0 %v1732_v24  ;;  %2180 = vmatprep.subr.mxu1 %v1798_v23  ;;  %vm1577_vm1 = vcmp.lt.s32.totalorder %v1576_v12, 1  ;;  %vm1578_vm2 = vcmp.gt.s32.totalorder %v1576_v12, 2 }
 0x26c   :  { %2181 = vmatpush3.msra.mxu1 %v1782_v25  ;;  %vm1579_vm3 = vmor %vm1577_vm1, %vm1578_vm2 }
 0x26d   :  { %2182 = vmatprep.subr.mxu1 %v1797_v27  ;;  %v1951_v20 = vsel %vm1579_vm3, 1.0, %v2474_v0 }
 0x26e   :  { %2183 = vmatpush3.msra.mxu1 %v1781_v28 }
 0x26f   :  { %2184 = vmatprep.subr.mxu1 %v1796_v30 }
 0x270   :  { %2185 = vmatpush3.msra.mxu1 %v1780_v31 }
 0x271   :  { %2186 = vmatprep.subr.mxu1 %v1795_v32 }
 0x272   :  { %2187 = vmatpush3.msra.mxu1 %v1779_v33 }
 0x273   :  { %2188 = vmatprep.subr.mxu1 %v1794_v34 }
 0x274   :  { %2189 = vmatpush3.msra.mxu1 %v1778_v13 }
 0x275   :  { %2190 = vmatprep.subr.mxu1 %v1793_v35 }
 0x276   :  { %2191 = vmatpush3.msra.mxu1 %v1777_v26 }
 0x277   :  { %2192 = vmatprep.subr.mxu1 %v1792_v36 }
 0x278   :  { %2193 = vmatpush3.msra.mxu1 %v1776_v37 }
 0x279   :  { %2194 = vmatprep.subr.mxu1 %v1791_v29 }
 0x27a   :  { %2195 = vmatpush3.msra.mxu1 %v1775_v38 }
 0x27b   :  { %2196 = vmatprep.subr.mxu1 %v1790_v39 }
 0x27c   :  { %2197 = vmatpush3.msra.mxu1 %v1774_v40 }
 0x27d   :  { %2198 = vmatprep.subr.mxu1 %v1789_v41 }
 0x27e   :  { %2199 = vmatpush3.msra.mxu1 %v1773_v42 }
 0x27f   :  { %2200 = vmatprep.subr.mxu1 %v1788_v43 }
 0x280   :  { %2201 = vmatpush3.msra.mxu1 %v1772_v44 }
 0x281   :  { %2202 = vmatprep.subr.mxu1 %v1787_v46 }
 0x282   :  { %2203 = vmatpush3.msra.mxu1 %v1771_v47 }
 0x283   :  { %2204 = vmatprep.subr.mxu1 %v1786_v48 }
 0x284   :  { %v1121_v53 = vpop.f32.mrf.mxu1  ;;  %2205 = vmatpush3.msra.mxu1 %v1770_v49 }
 0x285   :  { %2206 = vmatprep.subr.mxu1 %v1785_v51  ;;  %v1730_v56 = vmul.f32 %v1121_v53, %v1121_v53 }
 0x286   :  { %v1123_v57 = vpop.f32.mrf.mxu1  ;;  %2207 = vmatpush3.msra.mxu1 %v1769_v52 }
 0x287   :  { %v1731_v59 = vmul.f32 %v1123_v57, %v1123_v57  ;;  %2208 = vmatprep.subr.mxu1 %v1784_v54  ;;  %v1734_v62 = vadd.f32 %v1730_v56, %v1726_v60 }
 0x288   :  { %2209 = vmatpush3.msra.mxu1 %v1768_v55 }
 0x289   :  { %v1735_v61 = vadd.f32 %v1731_v59, %v1727_v58 }
 0x28b   :  { %1934 = vmatprep.mubr.f32.mxu1 %v1735_v61 }
 0x28c   :  { %1935 = vmatmul.mubr.f32.vlgmr.msra.gmra.mxu1 %v1734_v62 }
 0x2c1   :  { %v1209_v63 = vpop.f32.mrf.mxu0 }
 0x2c2   :  { %v1284_v3 = vmul.f32 %v1209_v63, %v1209_v63 }
 0x2c3   :  { %v2282_v1 = vpop.f32.mrf.mxu0  ;;  %v1280_v2 = vpop.f32.mrf.mxu1 }
 0x2c4   :  { %v1285_v4 = vmul.f32 %v1280_v2, %v1280_v2 }
 0x2c5   :  { %v2317_v5 = vpop.f32.mrf.mxu1 }
 0x2c6   :  { %v1286_v6 = vadd.f32 %v1285_v4, %v1284_v3 }
 0x2c8   :  { %2332 = vrsqrt.f32 %v1286_v6  ;;  %vm1289_vm4 = vcmp.eq.f32.partialorder %v1286_v6, inf  ;;  %v1292_v26 = vand.u32 2147483648, %v1286_v6  ;;  %vm1291_vm5 = vcmp.eq.f32.partialorder %v1286_v6, 0.0 }
 0x2d5   :  { %v2333_v24 = vpop.eup %2332 }
 0x2d6   :  { %v1288_v30 = vmul.f32 %v2333_v24, %v1286_v6 }
 0x2d8   :  { %v1290_v13 = vsel %vm1289_vm4, %v1286_v6, %v1288_v30 }
 0x2d9   :  { %v1293_v29 = vsel %vm1291_vm5, %v1292_v26, %v1290_v13 }
 0x2e7   :  { %v2035_v8 = vpop.f32.mrf.mxu0 }
 0x2e9   :  { %v2036_v11 = vpop.f32.mrf.mxu0 }
 0x2ea   :  { %v2037_v28 = vadd.f32 %v2036_v11, %v2035_v8 }
 0x307   :  { %v2105_v14 = vpop.f32.mrf.mxu0 }
 0x309   :  { %v2070_v10 = vpop.f32.mrf.mxu1  ;;  %v2106_v17 = vpop.f32.mrf.mxu0 }
 0x30a   :  { %v2107_v19 = vadd.f32 %v2106_v17, %v2105_v14 }
 0x30b   :  { %v2071_v15 = vpop.f32.mrf.mxu1 }
 0x30c   :  { %v1649_v22 = vadd.f32 %v2107_v19, %v1951_v20  ;;  %v2072_v25 = vadd.f32 %v2071_v15, %v2070_v10 }
 0x30e   :  { %v1507_v32 = vadd.f32 %v2072_v25, %v2037_v28 }
 0x329   :  { %v2140_v16 = vpop.f32.mrf.mxu1 }
 0x32b   :  { %v2141_v18 = vpop.f32.mrf.mxu1  ;;  %v2175_v27 = vpop.f32.mrf.mxu0 }
 0x32c   :  { %v2142_v21 = vadd.f32 %v2141_v18, %v2140_v16 }
 0x32d   :  { %v2176_v33 = vpop.f32.mrf.mxu0 }
 0x32e   :  { %v1719_v23 = vadd.f32 %v2142_v21, %v1649_v22  ;;  %v2177_v0 = vadd.f32 %v2176_v33, %v2175_v27 }
 0x330   :  { %2334 = vrcp.f32 %v1719_v23 }
 0x33d   :  { %v2335_v31 = vpop.eup %2334 }
 0x33e   :  { %v1723_v35 = vmul.f32 %v2335_v31, %v1507_v32 }
 0x340   :  { %v1940_v39 = vadd.f32 %v1723_v35, %v1293_v29 }
 0x34c   :  { %v2210_v34 = vpop.f32.mrf.mxu1 }
 0x34e   :  { %v2211_v36 = vpop.f32.mrf.mxu1 }
 0x34f   :  { %v2212_v37 = vadd.f32 %v2211_v36, %v2210_v34 }
 0x351   :  { %v1937_v38 = vadd.f32 %v2212_v37, %v2177_v0 }
 0x353   :  { %v1941_v40 = vadd.f32 %v1940_v39, %v1937_v38 }
 0x355   :  { %1942 = vst [vmem:[%s2696_s7] sm:$0xff] %v1941_v40 }
 0x356   :  { %1947 = vsyncpa [#allocation3], 1 }
 0x357   :  { %1948 = vsyncpa [#allocation5], 1 }
 0x358   :  { %1949 = vsyncpa [#allocation8], 1 }
 0x359   :  { %1950 = vsyncpa [#allocation11], 1 }

</bundles_post_ra>
